<compile_context>
chip_gen: v7x
topology: tpu7x:2x2x1
jax: 0.10.0
libtpu: 0.0.40
codegen_flags: <defaults>
</compile_context>

<pallas_src>
import jax
import jax.numpy as jnp
from jax import lax
from jax.experimental import pallas as pl
from jax.experimental.pallas import tpu as pltpu


# --------------------------- fused GRU + FC kernel ----------------------------
def _make_fused_gru_kernel(num_layers, T, B, H):
    def kernel(*refs):
        # refs layout:
        #   x_ref,
        #   [wi, wh, b_fused, bh_n] * num_layers,
        #   fc_w, fc_b,
        #   out_ref,
        #   seq_ref (scratch), gi_ref (scratch)
        x_ref = refs[0]
        layer_refs = []
        idx = 1
        for _ in range(num_layers):
            layer_refs.append(tuple(refs[idx:idx + 4]))
            idx += 4
        fc_w_ref = refs[idx]
        fc_b_ref = refs[idx + 1]
        out_ref = refs[idx + 2]
        seq_ref = refs[idx + 3]   # (T, B, H)   layer-output hidden sequence (VMEM)
        gi_ref = refs[idx + 4]    # (T, B, 3H)  hoisted input projections (VMEM)

        h_last = jnp.zeros((B, H), jnp.float32)

        for layer, (wi_ref, wh_ref, bf_ref, bhn_ref) in enumerate(layer_refs):
            wi = wi_ref[...]      # (F_l, 3H)   fused [r|z|n] input weights
            bf = bf_ref[...]      # (1, 3H)     bi_r+bh_r | bi_z+bh_z | bi_n

            # ---- input-projection pre-pass: off the recurrent critical path ----
            # T is small here; static unrolled matmuls pipeline freely on the MXU.
            for t in range(T):
                x_t = x_ref[t] if layer == 0 else seq_ref[t]        # (B, F_l)
                gi_ref[t] = (
                    jnp.dot(x_t, wi, preferred_element_type=jnp.float32) + bf
                )

            wh = wh_ref[...]      # (H, 3H)     fused hidden weights
            bh_n = bhn_ref[...]   # (1, H)      hidden bias of the n gate

            # ---- sequential recurrence: only h @ Wh remains inside the loop ----
            def step(t, h):
                gi_t = gi_ref[t]                                          # (B, 3H)
                gh = jnp.dot(h, wh, preferred_element_type=jnp.float32)   # (B, 3H)
                r = jax.nn.sigmoid(gi_t[:, 0:H] + gh[:, 0:H])
                z = jax.nn.sigmoid(gi_t[:, H:2 * H] + gh[:, H:2 * H])
                n = jnp.tanh(gi_t[:, 2 * H:] + r * (gh[:, 2 * H:] + bh_n))
                h_new = (1.0 - z) * n + z * h
                seq_ref[t] = h_new
                return h_new

            h_last = lax.fori_loop(
                0, T, step, jnp.zeros((B, H), jnp.float32), unroll=True
            )

        # ---- fused FC head on the last time step (no separate kernel launch) ----
        out_ref[...] = (
            jnp.dot(h_last, fc_w_ref[...], preferred_element_type=jnp.float32)
            + fc_b_ref[...]
        ).astype(out_ref.dtype)

    return kernel


# ------------------------------- full forward ---------------------------------
def gru_forward(x, params):
    """x: (B, T, input_size) batch-first, like the PyTorch module. h0 = zeros."""
    B, T, F = x.shape
    num_layers = len(params["gru"])
    H = params["gru"][0]["wh"].shape[0]
    C = params["fc_w"].shape[-1]

    # layout plumbing only: time-major so the kernel indexes time on the leading dim
    x_tm = jnp.transpose(x, (1, 0, 2)).astype(jnp.float32)   # (T, B, F)

    inputs = [x_tm]
    in_specs = [pl.BlockSpec((T, B, F), lambda: (0, 0, 0))]
    for layer in params["gru"]:
        for name in ("wi", "wh", "b_fused", "bh_n"):
            arr = layer[name]
            inputs.append(arr)
            in_specs.append(pl.BlockSpec(arr.shape, lambda: (0, 0)))
    for name in ("fc_w", "fc_b"):
        arr = params[name]
        inputs.append(arr)
        in_specs.append(pl.BlockSpec(arr.shape, lambda: (0, 0)))

    kernel = _make_fused_gru_kernel(num_layers, T, B, H)
    return pl.pallas_call(
        kernel,
        out_shape=jax.ShapeDtypeStruct((B, C), jnp.float32),
        in_specs=in_specs,
        out_specs=pl.BlockSpec((B, C), lambda: (0, 0)),
        scratch_shapes=[
            pltpu.VMEM((T, B, H), jnp.float32),       # inter-layer hidden sequence
            pltpu.VMEM((T, B, 3 * H), jnp.float32),   # hoisted input projections
        ],
    )(*inputs)


gru_forward = jax.jit(gru_forward)


# ------------------------------ parameter init --------------------------------
def init_params(key, input_size, hidden_size, num_layers, num_classes):
    """Fused-gate layout: wi (F,3H), wh (H,3H) with gate order [r|z|n] (PyTorch),
    b_fused = [bi_r+bh_r, bi_z+bh_z, bi_n] (1,3H), bh_n (1,H)."""
    H = hidden_size
    k = 1.0 / jnp.sqrt(jnp.float32(H))
    params = {"gru": []}
    for l in range(num_layers):
        f_in = input_size if l == 0 else H
        key, k1, k2, k3, k4 = jax.random.split(key, 5)
        wi = jax.random.uniform(k1, (f_in, 3 * H), jnp.float32, -k, k)
        wh = jax.random.uniform(k2, (H, 3 * H), jnp.float32, -k, k)
        bi = jax.random.uniform(k3, (1, 3 * H), jnp.float32, -k, k)
        bh = jax.random.uniform(k4, (1, 3 * H), jnp.float32, -k, k)
        b_fused = jnp.concatenate(
            [bi[:, :H] + bh[:, :H], bi[:, H:2 * H] + bh[:, H:2 * H], bi[:, 2 * H:]],
            axis=-1,
        )
        bh_n = bh[:, 2 * H:]
        params["gru"].append(
            {"wi": wi, "wh": wh, "b_fused": b_fused, "bh_n": bh_n}
        )
    key, k5, k6 = jax.random.split(key, 3)
    params["fc_w"] = jax.random.uniform(k5, (H, num_classes), jnp.float32, -k, k)
    params["fc_b"] = jax.random.uniform(k6, (1, num_classes), jnp.float32, -k, k)
    return params


# ------------------------------ pure-JAX reference ----------------------------
def gru_forward_ref(x, params):
    B = x.shape[0]
    H = params["gru"][0]["wh"].shape[0]
    x_tm = jnp.transpose(x, (1, 0, 2)).astype(jnp.float32)
    for layer in params["gru"]:
        wi, wh = layer["wi"], layer["wh"]
        bf, bhn = layer["b_fused"], layer["bh_n"]

        def step(h, x_t, wi=wi, wh=wh, bf=bf, bhn=bhn):
            gi = x_t @ wi + bf
            gh = h @ wh
            r = jax.nn.sigmoid(gi[:, :H] + gh[:, :H])
            z = jax.nn.sigmoid(gi[:, H:2 * H] + gh[:, H:2 * H])
            n = jnp.tanh(gi[:, 2 * H:] + r * (gh[:, 2 * H:] + bhn))
            h_new = (1.0 - z) * n + z * h
            return h_new, h_new

        h0 = jnp.zeros((B, H), jnp.float32)
        _, outs = jax.lax.scan(step, h0, x_tm)
        x_tm = outs
    return x_tm[-1] @ params["fc_w"] + params["fc_b"]


if __name__ == "__main__":
    # small shapes consistent with the module's forward (batch_first GRU + FC)
    batch, seq, input_size = 2, 8, 16
    hidden_size, num_layers, num_classes = 32, 2, 5

    key = jax.random.PRNGKey(0)
    key, kx, kp = jax.random.split(key, 3)
    x = jax.random.normal(kx, (batch, seq, input_size), jnp.float32)
    params = init_params(kp, input_size, hidden_size, num_layers, num_classes)

    out = gru_forward(x, params)
    out = jax.block_until_ready(out)
    assert out.shape == (batch, num_classes), out.shape

    ref = gru_forward_ref(x, params)
    assert jnp.allclose(out, ref, atol=1e-4, rtol=1e-4), (out, ref)

    print("KERNEL_OK")
</pallas_src>

<mosaic_0001>
module attributes {stable_mosaic.version = 11 : i64} {
  func.func @kernel(%arg0: memref<8x2x16xf32, #tpu.memory_space<vmem>>, %arg1: memref<16x96xf32, #tpu.memory_space<vmem>>, %arg2: memref<32x96xf32, #tpu.memory_space<vmem>>, %arg3: memref<1x96xf32, #tpu.memory_space<vmem>>, %arg4: memref<1x32xf32, #tpu.memory_space<vmem>>, %arg5: memref<32x96xf32, #tpu.memory_space<vmem>>, %arg6: memref<32x96xf32, #tpu.memory_space<vmem>>, %arg7: memref<1x96xf32, #tpu.memory_space<vmem>>, %arg8: memref<1x32xf32, #tpu.memory_space<vmem>>, %arg9: memref<32x5xf32, #tpu.memory_space<vmem>>, %arg10: memref<1x5xf32, #tpu.memory_space<vmem>>, %arg11: memref<2x5xf32, #tpu.memory_space<vmem>>, %arg12: memref<8x2x32xf32, #tpu.memory_space<vmem>>, %arg13: memref<8x2x96xf32, #tpu.memory_space<vmem>>) attributes {dimension_semantics = [], scalar_prefetch = 0 : i64, scratch_operands = 2 : i64, tpu.core_type = #tpu.core_type<tc>} {
    %c0 = arith.constant 0 : index
    %c0_0 = arith.constant 0 : index
    %0 = vector.load %arg1[%c0, %c0_0] : memref<16x96xf32, #tpu.memory_space<vmem>>, vector<16x96xf32>
    %c0_1 = arith.constant 0 : index
    %c0_2 = arith.constant 0 : index
    %1 = vector.load %arg3[%c0_1, %c0_2] : memref<1x96xf32, #tpu.memory_space<vmem>>, vector<1x96xf32>
    %c0_3 = arith.constant 0 : index
    %c0_4 = arith.constant 0 : index
    %c0_5 = arith.constant 0 : index
    %2 = vector.load %arg0[%c0_3, %c0_4, %c0_5] : memref<8x2x16xf32, #tpu.memory_space<vmem>>, vector<1x2x16xf32>
    %3 = vector.shape_cast %2 : vector<1x2x16xf32> to vector<2x16xf32>
    %cst = arith.constant dense<0.000000e+00> : vector<2x96xf32>
    %4 = tpu.matmul %3, %0, %cst {dimension_numbers = #tpu.dot_dimension_numbers<[1], [0], [0], [1], [0, 0, 1, 1], [], []>} : vector<2x16xf32>, vector<16x96xf32>, vector<2x96xf32> -> vector<2x96xf32>
    %5 = vector.broadcast %1 : vector<1x96xf32> to vector<2x96xf32>
    %6 = arith.addf %4, %5 : vector<2x96xf32>
    %c0_6 = arith.constant 0 : index
    %c0_7 = arith.constant 0 : index
    %c0_8 = arith.constant 0 : index
    %7 = vector.load %arg13[%c0_6, %c0_7, %c0_8] : memref<8x2x96xf32, #tpu.memory_space<vmem>>, vector<1x2x96xf32>
    %8 = vector.shape_cast %7 : vector<1x2x96xf32> to vector<2x96xf32>
    %9 = vector.shape_cast %6 : vector<2x96xf32> to vector<1x2x96xf32>
    tpu.vector_store %arg13[%c0_6, %c0_7, %c0_8], %9 {strides = array<i32>} : memref<8x2x96xf32, #tpu.memory_space<vmem>>, vector<1x2x96xf32>,
    %c1 = arith.constant 1 : index
    %c0_9 = arith.constant 0 : index
    %c0_10 = arith.constant 0 : index
    %10 = vector.load %arg0[%c1, %c0_9, %c0_10] : memref<8x2x16xf32, #tpu.memory_space<vmem>>, vector<1x2x16xf32>
    %11 = vector.shape_cast %10 : vector<1x2x16xf32> to vector<2x16xf32>
    %cst_11 = arith.constant dense<0.000000e+00> : vector<2x96xf32>
    %12 = tpu.matmul %11, %0, %cst_11 {dimension_numbers = #tpu.dot_dimension_numbers<[1], [0], [0], [1], [0, 0, 1, 1], [], []>} : vector<2x16xf32>, vector<16x96xf32>, vector<2x96xf32> -> vector<2x96xf32>
    %13 = vector.broadcast %1 : vector<1x96xf32> to vector<2x96xf32>
    %14 = arith.addf %12, %13 : vector<2x96xf32>
    %c1_12 = arith.constant 1 : index
    %c0_13 = arith.constant 0 : index
    %c0_14 = arith.constant 0 : index
    %15 = vector.load %arg13[%c1_12, %c0_13, %c0_14] : memref<8x2x96xf32, #tpu.memory_space<vmem>>, vector<1x2x96xf32>
    %16 = vector.shape_cast %15 : vector<1x2x96xf32> to vector<2x96xf32>
    %17 = vector.shape_cast %14 : vector<2x96xf32> to vector<1x2x96xf32>
    tpu.vector_store %arg13[%c1_12, %c0_13, %c0_14], %17 {strides = array<i32>} : memref<8x2x96xf32, #tpu.memory_space<vmem>>, vector<1x2x96xf32>,
    %c2 = arith.constant 2 : index
    %c0_15 = arith.constant 0 : index
    %c0_16 = arith.constant 0 : index
    %18 = vector.load %arg0[%c2, %c0_15, %c0_16] : memref<8x2x16xf32, #tpu.memory_space<vmem>>, vector<1x2x16xf32>
    %19 = vector.shape_cast %18 : vector<1x2x16xf32> to vector<2x16xf32>
    %cst_17 = arith.constant dense<0.000000e+00> : vector<2x96xf32>
    %20 = tpu.matmul %19, %0, %cst_17 {dimension_numbers = #tpu.dot_dimension_numbers<[1], [0], [0], [1], [0, 0, 1, 1], [], []>} : vector<2x16xf32>, vector<16x96xf32>, vector<2x96xf32> -> vector<2x96xf32>
    %21 = vector.broadcast %1 : vector<1x96xf32> to vector<2x96xf32>
    %22 = arith.addf %20, %21 : vector<2x96xf32>
    %c2_18 = arith.constant 2 : index
    %c0_19 = arith.constant 0 : index
    %c0_20 = arith.constant 0 : index
    %23 = vector.load %arg13[%c2_18, %c0_19, %c0_20] : memref<8x2x96xf32, #tpu.memory_space<vmem>>, vector<1x2x96xf32>
    %24 = vector.shape_cast %23 : vector<1x2x96xf32> to vector<2x96xf32>
    %25 = vector.shape_cast %22 : vector<2x96xf32> to vector<1x2x96xf32>
    tpu.vector_store %arg13[%c2_18, %c0_19, %c0_20], %25 {strides = array<i32>} : memref<8x2x96xf32, #tpu.memory_space<vmem>>, vector<1x2x96xf32>,
    %c3 = arith.constant 3 : index
    %c0_21 = arith.constant 0 : index
    %c0_22 = arith.constant 0 : index
    %26 = vector.load %arg0[%c3, %c0_21, %c0_22] : memref<8x2x16xf32, #tpu.memory_space<vmem>>, vector<1x2x16xf32>
    %27 = vector.shape_cast %26 : vector<1x2x16xf32> to vector<2x16xf32>
    %cst_23 = arith.constant dense<0.000000e+00> : vector<2x96xf32>
    %28 = tpu.matmul %27, %0, %cst_23 {dimension_numbers = #tpu.dot_dimension_numbers<[1], [0], [0], [1], [0, 0, 1, 1], [], []>} : vector<2x16xf32>, vector<16x96xf32>, vector<2x96xf32> -> vector<2x96xf32>
    %29 = vector.broadcast %1 : vector<1x96xf32> to vector<2x96xf32>
    %30 = arith.addf %28, %29 : vector<2x96xf32>
    %c3_24 = arith.constant 3 : index
    %c0_25 = arith.constant 0 : index
    %c0_26 = arith.constant 0 : index
    %31 = vector.load %arg13[%c3_24, %c0_25, %c0_26] : memref<8x2x96xf32, #tpu.memory_space<vmem>>, vector<1x2x96xf32>
    %32 = vector.shape_cast %31 : vector<1x2x96xf32> to vector<2x96xf32>
    %33 = vector.shape_cast %30 : vector<2x96xf32> to vector<1x2x96xf32>
    tpu.vector_store %arg13[%c3_24, %c0_25, %c0_26], %33 {strides = array<i32>} : memref<8x2x96xf32, #tpu.memory_space<vmem>>, vector<1x2x96xf32>,
    %c4 = arith.constant 4 : index
    %c0_27 = arith.constant 0 : index
    %c0_28 = arith.constant 0 : index
    %34 = vector.load %arg0[%c4, %c0_27, %c0_28] : memref<8x2x16xf32, #tpu.memory_space<vmem>>, vector<1x2x16xf32>
    %35 = vector.shape_cast %34 : vector<1x2x16xf32> to vector<2x16xf32>
    %cst_29 = arith.constant dense<0.000000e+00> : vector<2x96xf32>
    %36 = tpu.matmul %35, %0, %cst_29 {dimension_numbers = #tpu.dot_dimension_numbers<[1], [0], [0], [1], [0, 0, 1, 1], [], []>} : vector<2x16xf32>, vector<16x96xf32>, vector<2x96xf32> -> vector<2x96xf32>
    %37 = vector.broadcast %1 : vector<1x96xf32> to vector<2x96xf32>
    %38 = arith.addf %36, %37 : vector<2x96xf32>
    %c4_30 = arith.constant 4 : index
    %c0_31 = arith.constant 0 : index
    %c0_32 = arith.constant 0 : index
    %39 = vector.load %arg13[%c4_30, %c0_31, %c0_32] : memref<8x2x96xf32, #tpu.memory_space<vmem>>, vector<1x2x96xf32>
    %40 = vector.shape_cast %39 : vector<1x2x96xf32> to vector<2x96xf32>
    %41 = vector.shape_cast %38 : vector<2x96xf32> to vector<1x2x96xf32>
    tpu.vector_store %arg13[%c4_30, %c0_31, %c0_32], %41 {strides = array<i32>} : memref<8x2x96xf32, #tpu.memory_space<vmem>>, vector<1x2x96xf32>,
    %c5 = arith.constant 5 : index
    %c0_33 = arith.constant 0 : index
    %c0_34 = arith.constant 0 : index
    %42 = vector.load %arg0[%c5, %c0_33, %c0_34] : memref<8x2x16xf32, #tpu.memory_space<vmem>>, vector<1x2x16xf32>
    %43 = vector.shape_cast %42 : vector<1x2x16xf32> to vector<2x16xf32>
    %cst_35 = arith.constant dense<0.000000e+00> : vector<2x96xf32>
    %44 = tpu.matmul %43, %0, %cst_35 {dimension_numbers = #tpu.dot_dimension_numbers<[1], [0], [0], [1], [0, 0, 1, 1], [], []>} : vector<2x16xf32>, vector<16x96xf32>, vector<2x96xf32> -> vector<2x96xf32>
    %45 = vector.broadcast %1 : vector<1x96xf32> to vector<2x96xf32>
    %46 = arith.addf %44, %45 : vector<2x96xf32>
    %c5_36 = arith.constant 5 : index
    %c0_37 = arith.constant 0 : index
    %c0_38 = arith.constant 0 : index
    %47 = vector.load %arg13[%c5_36, %c0_37, %c0_38] : memref<8x2x96xf32, #tpu.memory_space<vmem>>, vector<1x2x96xf32>
    %48 = vector.shape_cast %47 : vector<1x2x96xf32> to vector<2x96xf32>
    %49 = vector.shape_cast %46 : vector<2x96xf32> to vector<1x2x96xf32>
    tpu.vector_store %arg13[%c5_36, %c0_37, %c0_38], %49 {strides = array<i32>} : memref<8x2x96xf32, #tpu.memory_space<vmem>>, vector<1x2x96xf32>,
    %c6 = arith.constant 6 : index
    %c0_39 = arith.constant 0 : index
    %c0_40 = arith.constant 0 : index
    %50 = vector.load %arg0[%c6, %c0_39, %c0_40] : memref<8x2x16xf32, #tpu.memory_space<vmem>>, vector<1x2x16xf32>
    %51 = vector.shape_cast %50 : vector<1x2x16xf32> to vector<2x16xf32>
    %cst_41 = arith.constant dense<0.000000e+00> : vector<2x96xf32>
    %52 = tpu.matmul %51, %0, %cst_41 {dimension_numbers = #tpu.dot_dimension_numbers<[1], [0], [0], [1], [0, 0, 1, 1], [], []>} : vector<2x16xf32>, vector<16x96xf32>, vector<2x96xf32> -> vector<2x96xf32>
    %53 = vector.broadcast %1 : vector<1x96xf32> to vector<2x96xf32>
    %54 = arith.addf %52, %53 : vector<2x96xf32>
    %c6_42 = arith.constant 6 : index
    %c0_43 = arith.constant 0 : index
    %c0_44 = arith.constant 0 : index
    %55 = vector.load %arg13[%c6_42, %c0_43, %c0_44] : memref<8x2x96xf32, #tpu.memory_space<vmem>>, vector<1x2x96xf32>
    %56 = vector.shape_cast %55 : vector<1x2x96xf32> to vector<2x96xf32>
    %57 = vector.shape_cast %54 : vector<2x96xf32> to vector<1x2x96xf32>
    tpu.vector_store %arg13[%c6_42, %c0_43, %c0_44], %57 {strides = array<i32>} : memref<8x2x96xf32, #tpu.memory_space<vmem>>, vector<1x2x96xf32>,
    %c7 = arith.constant 7 : index
    %c0_45 = arith.constant 0 : index
    %c0_46 = arith.constant 0 : index
    %58 = vector.load %arg0[%c7, %c0_45, %c0_46] : memref<8x2x16xf32, #tpu.memory_space<vmem>>, vector<1x2x16xf32>
    %59 = vector.shape_cast %58 : vector<1x2x16xf32> to vector<2x16xf32>
    %cst_47 = arith.constant dense<0.000000e+00> : vector<2x96xf32>
    %60 = tpu.matmul %59, %0, %cst_47 {dimension_numbers = #tpu.dot_dimension_numbers<[1], [0], [0], [1], [0, 0, 1, 1], [], []>} : vector<2x16xf32>, vector<16x96xf32>, vector<2x96xf32> -> vector<2x96xf32>
    %61 = vector.broadcast %1 : vector<1x96xf32> to vector<2x96xf32>
    %62 = arith.addf %60, %61 : vector<2x96xf32>
    %c7_48 = arith.constant 7 : index
    %c0_49 = arith.constant 0 : index
    %c0_50 = arith.constant 0 : index
    %63 = vector.load %arg13[%c7_48, %c0_49, %c0_50] : memref<8x2x96xf32, #tpu.memory_space<vmem>>, vector<1x2x96xf32>
    %64 = vector.shape_cast %63 : vector<1x2x96xf32> to vector<2x96xf32>
    %65 = vector.shape_cast %62 : vector<2x96xf32> to vector<1x2x96xf32>
    tpu.vector_store %arg13[%c7_48, %c0_49, %c0_50], %65 {strides = array<i32>} : memref<8x2x96xf32, #tpu.memory_space<vmem>>, vector<1x2x96xf32>,
    %c0_51 = arith.constant 0 : index
    %c0_52 = arith.constant 0 : index
    %66 = vector.load %arg2[%c0_51, %c0_52] : memref<32x96xf32, #tpu.memory_space<vmem>>, vector<32x96xf32>
    %c0_53 = arith.constant 0 : index
    %c0_54 = arith.constant 0 : index
    %67 = vector.load %arg4[%c0_53, %c0_54] : memref<1x32xf32, #tpu.memory_space<vmem>>, vector<1x32xf32>
    %cst_55 = arith.constant 0.000000e+00 : f32
    %68 = vector.broadcast %cst_55 : f32 to vector<2x32xf32>
    %c0_i32 = arith.constant 0 : i32
    %69 = arith.index_cast %c0_i32 : i32 to index
    %c0_56 = arith.constant 0 : index
    %c0_57 = arith.constant 0 : index
    %70 = vector.load %arg13[%69, %c0_56, %c0_57] : memref<8x2x96xf32, #tpu.memory_space<vmem>>, vector<1x2x96xf32>
    %71 = vector.shape_cast %70 : vector<1x2x96xf32> to vector<2x96xf32>
    %cst_58 = arith.constant dense<0.000000e+00> : vector<2x96xf32>
    %72 = tpu.matmul %68, %66, %cst_58 {dimension_numbers = #tpu.dot_dimension_numbers<[1], [0], [0], [1], [0, 0, 1, 1], [], []>} : vector<2x32xf32>, vector<32x96xf32>, vector<2x96xf32> -> vector<2x96xf32>
    %73 = vector.extract_strided_slice %71 {offsets = [0, 0], sizes = [2, 32], strides = [1, 1]} : vector<2x96xf32> to vector<2x32xf32>
    %74 = vector.extract_strided_slice %72 {offsets = [0, 0], sizes = [2, 32], strides = [1, 1]} : vector<2x96xf32> to vector<2x32xf32>
    %75 = arith.addf %73, %74 : vector<2x32xf32>
    %76 = arith.negf %75 : vector<2x32xf32>
    %77 = math.exp %76 : vector<2x32xf32>
    %cst_59 = arith.constant 1.000000e+00 : f32
    %78 = vector.broadcast %cst_59 : f32 to vector<2x32xf32>
    %79 = arith.addf %78, %77 : vector<2x32xf32>
    %80 = arith.divf %78, %79 : vector<2x32xf32>
    %81 = vector.extract_strided_slice %71 {offsets = [0, 32], sizes = [2, 32], strides = [1, 1]} : vector<2x96xf32> to vector<2x32xf32>
    %82 = vector.extract_strided_slice %72 {offsets = [0, 32], sizes = [2, 32], strides = [1, 1]} : vector<2x96xf32> to vector<2x32xf32>
    %83 = arith.addf %81, %82 : vector<2x32xf32>
    %84 = arith.negf %83 : vector<2x32xf32>
    %85 = math.exp %84 : vector<2x32xf32>
    %cst_60 = arith.constant 1.000000e+00 : f32
    %86 = vector.broadcast %cst_60 : f32 to vector<2x32xf32>
    %87 = arith.addf %86, %85 : vector<2x32xf32>
    %88 = arith.divf %86, %87 : vector<2x32xf32>
    %89 = vector.extract_strided_slice %71 {offsets = [0, 64], sizes = [2, 32], strides = [1, 1]} : vector<2x96xf32> to vector<2x32xf32>
    %90 = vector.extract_strided_slice %72 {offsets = [0, 64], sizes = [2, 32], strides = [1, 1]} : vector<2x96xf32> to vector<2x32xf32>
    %91 = vector.broadcast %67 : vector<1x32xf32> to vector<2x32xf32>
    %92 = arith.addf %90, %91 : vector<2x32xf32>
    %93 = arith.mulf %80, %92 : vector<2x32xf32>
    %94 = arith.addf %89, %93 : vector<2x32xf32>
    %95 = math.tanh %94 : vector<2x32xf32>
    %cst_61 = arith.constant 1.000000e+00 : f32
    %96 = vector.broadcast %cst_61 : f32 to vector<2x32xf32>
    %97 = arith.subf %96, %88 : vector<2x32xf32>
    %98 = arith.mulf %97, %95 : vector<2x32xf32>
    %99 = arith.mulf %88, %68 : vector<2x32xf32>
    %100 = arith.addf %98, %99 : vector<2x32xf32>
    %101 = arith.index_cast %c0_i32 : i32 to index
    %c0_62 = arith.constant 0 : index
    %c0_63 = arith.constant 0 : index
    %102 = vector.load %arg12[%101, %c0_62, %c0_63] : memref<8x2x32xf32, #tpu.memory_space<vmem>>, vector<1x2x32xf32>
    %103 = vector.shape_cast %102 : vector<1x2x32xf32> to vector<2x32xf32>
    %104 = vector.shape_cast %100 : vector<2x32xf32> to vector<1x2x32xf32>
    tpu.vector_store %arg12[%101, %c0_62, %c0_63], %104 {strides = array<i32>} : memref<8x2x32xf32, #tpu.memory_space<vmem>>, vector<1x2x32xf32>,
    %c1_i32 = arith.constant 1 : i32
    %105 = arith.index_cast %c1_i32 : i32 to index
    %c0_64 = arith.constant 0 : index
    %c0_65 = arith.constant 0 : index
    %106 = vector.load %arg13[%105, %c0_64, %c0_65] : memref<8x2x96xf32, #tpu.memory_space<vmem>>, vector<1x2x96xf32>
    %107 = vector.shape_cast %106 : vector<1x2x96xf32> to vector<2x96xf32>
    %cst_66 = arith.constant dense<0.000000e+00> : vector<2x96xf32>
    %108 = tpu.matmul %100, %66, %cst_66 {dimension_numbers = #tpu.dot_dimension_numbers<[1], [0], [0], [1], [0, 0, 1, 1], [], []>} : vector<2x32xf32>, vector<32x96xf32>, vector<2x96xf32> -> vector<2x96xf32>
    %109 = vector.extract_strided_slice %107 {offsets = [0, 0], sizes = [2, 32], strides = [1, 1]} : vector<2x96xf32> to vector<2x32xf32>
    %110 = vector.extract_strided_slice %108 {offsets = [0, 0], sizes = [2, 32], strides = [1, 1]} : vector<2x96xf32> to vector<2x32xf32>
    %111 = arith.addf %109, %110 : vector<2x32xf32>
    %112 = arith.negf %111 : vector<2x32xf32>
    %113 = math.exp %112 : vector<2x32xf32>
    %cst_67 = arith.constant 1.000000e+00 : f32
    %114 = vector.broadcast %cst_67 : f32 to vector<2x32xf32>
    %115 = arith.addf %114, %113 : vector<2x32xf32>
    %116 = arith.divf %114, %115 : vector<2x32xf32>
    %117 = vector.extract_strided_slice %107 {offsets = [0, 32], sizes = [2, 32], strides = [1, 1]} : vector<2x96xf32> to vector<2x32xf32>
    %118 = vector.extract_strided_slice %108 {offsets = [0, 32], sizes = [2, 32], strides = [1, 1]} : vector<2x96xf32> to vector<2x32xf32>
    %119 = arith.addf %117, %118 : vector<2x32xf32>
    %120 = arith.negf %119 : vector<2x32xf32>
    %121 = math.exp %120 : vector<2x32xf32>
    %cst_68 = arith.constant 1.000000e+00 : f32
    %122 = vector.broadcast %cst_68 : f32 to vector<2x32xf32>
    %123 = arith.addf %122, %121 : vector<2x32xf32>
    %124 = arith.divf %122, %123 : vector<2x32xf32>
    %125 = vector.extract_strided_slice %107 {offsets = [0, 64], sizes = [2, 32], strides = [1, 1]} : vector<2x96xf32> to vector<2x32xf32>
    %126 = vector.extract_strided_slice %108 {offsets = [0, 64], sizes = [2, 32], strides = [1, 1]} : vector<2x96xf32> to vector<2x32xf32>
    %127 = vector.broadcast %67 : vector<1x32xf32> to vector<2x32xf32>
    %128 = arith.addf %126, %127 : vector<2x32xf32>
    %129 = arith.mulf %116, %128 : vector<2x32xf32>
    %130 = arith.addf %125, %129 : vector<2x32xf32>
    %131 = math.tanh %130 : vector<2x32xf32>
    %cst_69 = arith.constant 1.000000e+00 : f32
    %132 = vector.broadcast %cst_69 : f32 to vector<2x32xf32>
    %133 = arith.subf %132, %124 : vector<2x32xf32>
    %134 = arith.mulf %133, %131 : vector<2x32xf32>
    %135 = arith.mulf %124, %100 : vector<2x32xf32>
    %136 = arith.addf %134, %135 : vector<2x32xf32>
    %137 = arith.index_cast %c1_i32 : i32 to index
    %c0_70 = arith.constant 0 : index
    %c0_71 = arith.constant 0 : index
    %138 = vector.load %arg12[%137, %c0_70, %c0_71] : memref<8x2x32xf32, #tpu.memory_space<vmem>>, vector<1x2x32xf32>
    %139 = vector.shape_cast %138 : vector<1x2x32xf32> to vector<2x32xf32>
    %140 = vector.shape_cast %136 : vector<2x32xf32> to vector<1x2x32xf32>
    tpu.vector_store %arg12[%137, %c0_70, %c0_71], %140 {strides = array<i32>} : memref<8x2x32xf32, #tpu.memory_space<vmem>>, vector<1x2x32xf32>,
    %c2_i32 = arith.constant 2 : i32
    %141 = arith.index_cast %c2_i32 : i32 to index
    %c0_72 = arith.constant 0 : index
    %c0_73 = arith.constant 0 : index
    %142 = vector.load %arg13[%141, %c0_72, %c0_73] : memref<8x2x96xf32, #tpu.memory_space<vmem>>, vector<1x2x96xf32>
    %143 = vector.shape_cast %142 : vector<1x2x96xf32> to vector<2x96xf32>
    %cst_74 = arith.constant dense<0.000000e+00> : vector<2x96xf32>
    %144 = tpu.matmul %136, %66, %cst_74 {dimension_numbers = #tpu.dot_dimension_numbers<[1], [0], [0], [1], [0, 0, 1, 1], [], []>} : vector<2x32xf32>, vector<32x96xf32>, vector<2x96xf32> -> vector<2x96xf32>
    %145 = vector.extract_strided_slice %143 {offsets = [0, 0], sizes = [2, 32], strides = [1, 1]} : vector<2x96xf32> to vector<2x32xf32>
    %146 = vector.extract_strided_slice %144 {offsets = [0, 0], sizes = [2, 32], strides = [1, 1]} : vector<2x96xf32> to vector<2x32xf32>
    %147 = arith.addf %145, %146 : vector<2x32xf32>
    %148 = arith.negf %147 : vector<2x32xf32>
    %149 = math.exp %148 : vector<2x32xf32>
    %cst_75 = arith.constant 1.000000e+00 : f32
    %150 = vector.broadcast %cst_75 : f32 to vector<2x32xf32>
    %151 = arith.addf %150, %149 : vector<2x32xf32>
    %152 = arith.divf %150, %151 : vector<2x32xf32>
    %153 = vector.extract_strided_slice %143 {offsets = [0, 32], sizes = [2, 32], strides = [1, 1]} : vector<2x96xf32> to vector<2x32xf32>
    %154 = vector.extract_strided_slice %144 {offsets = [0, 32], sizes = [2, 32], strides = [1, 1]} : vector<2x96xf32> to vector<2x32xf32>
    %155 = arith.addf %153, %154 : vector<2x32xf32>
    %156 = arith.negf %155 : vector<2x32xf32>
    %157 = math.exp %156 : vector<2x32xf32>
    %cst_76 = arith.constant 1.000000e+00 : f32
    %158 = vector.broadcast %cst_76 : f32 to vector<2x32xf32>
    %159 = arith.addf %158, %157 : vector<2x32xf32>
    %160 = arith.divf %158, %159 : vector<2x32xf32>
    %161 = vector.extract_strided_slice %143 {offsets = [0, 64], sizes = [2, 32], strides = [1, 1]} : vector<2x96xf32> to vector<2x32xf32>
    %162 = vector.extract_strided_slice %144 {offsets = [0, 64], sizes = [2, 32], strides = [1, 1]} : vector<2x96xf32> to vector<2x32xf32>
    %163 = vector.broadcast %67 : vector<1x32xf32> to vector<2x32xf32>
    %164 = arith.addf %162, %163 : vector<2x32xf32>
    %165 = arith.mulf %152, %164 : vector<2x32xf32>
    %166 = arith.addf %161, %165 : vector<2x32xf32>
    %167 = math.tanh %166 : vector<2x32xf32>
    %cst_77 = arith.constant 1.000000e+00 : f32
    %168 = vector.broadcast %cst_77 : f32 to vector<2x32xf32>
    %169 = arith.subf %168, %160 : vector<2x32xf32>
    %170 = arith.mulf %169, %167 : vector<2x32xf32>
    %171 = arith.mulf %160, %136 : vector<2x32xf32>
    %172 = arith.addf %170, %171 : vector<2x32xf32>
    %173 = arith.index_cast %c2_i32 : i32 to index
    %c0_78 = arith.constant 0 : index
    %c0_79 = arith.constant 0 : index
    %174 = vector.load %arg12[%173, %c0_78, %c0_79] : memref<8x2x32xf32, #tpu.memory_space<vmem>>, vector<1x2x32xf32>
    %175 = vector.shape_cast %174 : vector<1x2x32xf32> to vector<2x32xf32>
    %176 = vector.shape_cast %172 : vector<2x32xf32> to vector<1x2x32xf32>
    tpu.vector_store %arg12[%173, %c0_78, %c0_79], %176 {strides = array<i32>} : memref<8x2x32xf32, #tpu.memory_space<vmem>>, vector<1x2x32xf32>,
    %c3_i32 = arith.constant 3 : i32
    %177 = arith.index_cast %c3_i32 : i32 to index
    %c0_80 = arith.constant 0 : index
    %c0_81 = arith.constant 0 : index
    %178 = vector.load %arg13[%177, %c0_80, %c0_81] : memref<8x2x96xf32, #tpu.memory_space<vmem>>, vector<1x2x96xf32>
    %179 = vector.shape_cast %178 : vector<1x2x96xf32> to vector<2x96xf32>
    %cst_82 = arith.constant dense<0.000000e+00> : vector<2x96xf32>
    %180 = tpu.matmul %172, %66, %cst_82 {dimension_numbers = #tpu.dot_dimension_numbers<[1], [0], [0], [1], [0, 0, 1, 1], [], []>} : vector<2x32xf32>, vector<32x96xf32>, vector<2x96xf32> -> vector<2x96xf32>
    %181 = vector.extract_strided_slice %179 {offsets = [0, 0], sizes = [2, 32], strides = [1, 1]} : vector<2x96xf32> to vector<2x32xf32>
    %182 = vector.extract_strided_slice %180 {offsets = [0, 0], sizes = [2, 32], strides = [1, 1]} : vector<2x96xf32> to vector<2x32xf32>
    %183 = arith.addf %181, %182 : vector<2x32xf32>
    %184 = arith.negf %183 : vector<2x32xf32>
    %185 = math.exp %184 : vector<2x32xf32>
    %cst_83 = arith.constant 1.000000e+00 : f32
    %186 = vector.broadcast %cst_83 : f32 to vector<2x32xf32>
    %187 = arith.addf %186, %185 : vector<2x32xf32>
    %188 = arith.divf %186, %187 : vector<2x32xf32>
    %189 = vector.extract_strided_slice %179 {offsets = [0, 32], sizes = [2, 32], strides = [1, 1]} : vector<2x96xf32> to vector<2x32xf32>
    %190 = vector.extract_strided_slice %180 {offsets = [0, 32], sizes = [2, 32], strides = [1, 1]} : vector<2x96xf32> to vector<2x32xf32>
    %191 = arith.addf %189, %190 : vector<2x32xf32>
    %192 = arith.negf %191 : vector<2x32xf32>
    %193 = math.exp %192 : vector<2x32xf32>
    %cst_84 = arith.constant 1.000000e+00 : f32
    %194 = vector.broadcast %cst_84 : f32 to vector<2x32xf32>
    %195 = arith.addf %194, %193 : vector<2x32xf32>
    %196 = arith.divf %194, %195 : vector<2x32xf32>
    %197 = vector.extract_strided_slice %179 {offsets = [0, 64], sizes = [2, 32], strides = [1, 1]} : vector<2x96xf32> to vector<2x32xf32>
    %198 = vector.extract_strided_slice %180 {offsets = [0, 64], sizes = [2, 32], strides = [1, 1]} : vector<2x96xf32> to vector<2x32xf32>
    %199 = vector.broadcast %67 : vector<1x32xf32> to vector<2x32xf32>
    %200 = arith.addf %198, %199 : vector<2x32xf32>
    %201 = arith.mulf %188, %200 : vector<2x32xf32>
    %202 = arith.addf %197, %201 : vector<2x32xf32>
    %203 = math.tanh %202 : vector<2x32xf32>
    %cst_85 = arith.constant 1.000000e+00 : f32
    %204 = vector.broadcast %cst_85 : f32 to vector<2x32xf32>
    %205 = arith.subf %204, %196 : vector<2x32xf32>
    %206 = arith.mulf %205, %203 : vector<2x32xf32>
    %207 = arith.mulf %196, %172 : vector<2x32xf32>
    %208 = arith.addf %206, %207 : vector<2x32xf32>
    %209 = arith.index_cast %c3_i32 : i32 to index
    %c0_86 = arith.constant 0 : index
    %c0_87 = arith.constant 0 : index
    %210 = vector.load %arg12[%209, %c0_86, %c0_87] : memref<8x2x32xf32, #tpu.memory_space<vmem>>, vector<1x2x32xf32>
    %211 = vector.shape_cast %210 : vector<1x2x32xf32> to vector<2x32xf32>
    %212 = vector.shape_cast %208 : vector<2x32xf32> to vector<1x2x32xf32>
    tpu.vector_store %arg12[%209, %c0_86, %c0_87], %212 {strides = array<i32>} : memref<8x2x32xf32, #tpu.memory_space<vmem>>, vector<1x2x32xf32>,
    %c4_i32 = arith.constant 4 : i32
    %213 = arith.index_cast %c4_i32 : i32 to index
    %c0_88 = arith.constant 0 : index
    %c0_89 = arith.constant 0 : index
    %214 = vector.load %arg13[%213, %c0_88, %c0_89] : memref<8x2x96xf32, #tpu.memory_space<vmem>>, vector<1x2x96xf32>
    %215 = vector.shape_cast %214 : vector<1x2x96xf32> to vector<2x96xf32>
    %cst_90 = arith.constant dense<0.000000e+00> : vector<2x96xf32>
    %216 = tpu.matmul %208, %66, %cst_90 {dimension_numbers = #tpu.dot_dimension_numbers<[1], [0], [0], [1], [0, 0, 1, 1], [], []>} : vector<2x32xf32>, vector<32x96xf32>, vector<2x96xf32> -> vector<2x96xf32>
    %217 = vector.extract_strided_slice %215 {offsets = [0, 0], sizes = [2, 32], strides = [1, 1]} : vector<2x96xf32> to vector<2x32xf32>
    %218 = vector.extract_strided_slice %216 {offsets = [0, 0], sizes = [2, 32], strides = [1, 1]} : vector<2x96xf32> to vector<2x32xf32>
    %219 = arith.addf %217, %218 : vector<2x32xf32>
    %220 = arith.negf %219 : vector<2x32xf32>
    %221 = math.exp %220 : vector<2x32xf32>
    %cst_91 = arith.constant 1.000000e+00 : f32
    %222 = vector.broadcast %cst_91 : f32 to vector<2x32xf32>
    %223 = arith.addf %222, %221 : vector<2x32xf32>
    %224 = arith.divf %222, %223 : vector<2x32xf32>
    %225 = vector.extract_strided_slice %215 {offsets = [0, 32], sizes = [2, 32], strides = [1, 1]} : vector<2x96xf32> to vector<2x32xf32>
    %226 = vector.extract_strided_slice %216 {offsets = [0, 32], sizes = [2, 32], strides = [1, 1]} : vector<2x96xf32> to vector<2x32xf32>
    %227 = arith.addf %225, %226 : vector<2x32xf32>
    %228 = arith.negf %227 : vector<2x32xf32>
    %229 = math.exp %228 : vector<2x32xf32>
    %cst_92 = arith.constant 1.000000e+00 : f32
    %230 = vector.broadcast %cst_92 : f32 to vector<2x32xf32>
    %231 = arith.addf %230, %229 : vector<2x32xf32>
    %232 = arith.divf %230, %231 : vector<2x32xf32>
    %233 = vector.extract_strided_slice %215 {offsets = [0, 64], sizes = [2, 32], strides = [1, 1]} : vector<2x96xf32> to vector<2x32xf32>
    %234 = vector.extract_strided_slice %216 {offsets = [0, 64], sizes = [2, 32], strides = [1, 1]} : vector<2x96xf32> to vector<2x32xf32>
    %235 = vector.broadcast %67 : vector<1x32xf32> to vector<2x32xf32>
    %236 = arith.addf %234, %235 : vector<2x32xf32>
    %237 = arith.mulf %224, %236 : vector<2x32xf32>
    %238 = arith.addf %233, %237 : vector<2x32xf32>
    %239 = math.tanh %238 : vector<2x32xf32>
    %cst_93 = arith.constant 1.000000e+00 : f32
    %240 = vector.broadcast %cst_93 : f32 to vector<2x32xf32>
    %241 = arith.subf %240, %232 : vector<2x32xf32>
    %242 = arith.mulf %241, %239 : vector<2x32xf32>
    %243 = arith.mulf %232, %208 : vector<2x32xf32>
    %244 = arith.addf %242, %243 : vector<2x32xf32>
    %245 = arith.index_cast %c4_i32 : i32 to index
    %c0_94 = arith.constant 0 : index
    %c0_95 = arith.constant 0 : index
    %246 = vector.load %arg12[%245, %c0_94, %c0_95] : memref<8x2x32xf32, #tpu.memory_space<vmem>>, vector<1x2x32xf32>
    %247 = vector.shape_cast %246 : vector<1x2x32xf32> to vector<2x32xf32>
    %248 = vector.shape_cast %244 : vector<2x32xf32> to vector<1x2x32xf32>
    tpu.vector_store %arg12[%245, %c0_94, %c0_95], %248 {strides = array<i32>} : memref<8x2x32xf32, #tpu.memory_space<vmem>>, vector<1x2x32xf32>,
    %c5_i32 = arith.constant 5 : i32
    %249 = arith.index_cast %c5_i32 : i32 to index
    %c0_96 = arith.constant 0 : index
    %c0_97 = arith.constant 0 : index
    %250 = vector.load %arg13[%249, %c0_96, %c0_97] : memref<8x2x96xf32, #tpu.memory_space<vmem>>, vector<1x2x96xf32>
    %251 = vector.shape_cast %250 : vector<1x2x96xf32> to vector<2x96xf32>
    %cst_98 = arith.constant dense<0.000000e+00> : vector<2x96xf32>
    %252 = tpu.matmul %244, %66, %cst_98 {dimension_numbers = #tpu.dot_dimension_numbers<[1], [0], [0], [1], [0, 0, 1, 1], [], []>} : vector<2x32xf32>, vector<32x96xf32>, vector<2x96xf32> -> vector<2x96xf32>
    %253 = vector.extract_strided_slice %251 {offsets = [0, 0], sizes = [2, 32], strides = [1, 1]} : vector<2x96xf32> to vector<2x32xf32>
    %254 = vector.extract_strided_slice %252 {offsets = [0, 0], sizes = [2, 32], strides = [1, 1]} : vector<2x96xf32> to vector<2x32xf32>
    %255 = arith.addf %253, %254 : vector<2x32xf32>
    %256 = arith.negf %255 : vector<2x32xf32>
    %257 = math.exp %256 : vector<2x32xf32>
    %cst_99 = arith.constant 1.000000e+00 : f32
    %258 = vector.broadcast %cst_99 : f32 to vector<2x32xf32>
    %259 = arith.addf %258, %257 : vector<2x32xf32>
    %260 = arith.divf %258, %259 : vector<2x32xf32>
    %261 = vector.extract_strided_slice %251 {offsets = [0, 32], sizes = [2, 32], strides = [1, 1]} : vector<2x96xf32> to vector<2x32xf32>
    %262 = vector.extract_strided_slice %252 {offsets = [0, 32], sizes = [2, 32], strides = [1, 1]} : vector<2x96xf32> to vector<2x32xf32>
    %263 = arith.addf %261, %262 : vector<2x32xf32>
    %264 = arith.negf %263 : vector<2x32xf32>
    %265 = math.exp %264 : vector<2x32xf32>
    %cst_100 = arith.constant 1.000000e+00 : f32
    %266 = vector.broadcast %cst_100 : f32 to vector<2x32xf32>
    %267 = arith.addf %266, %265 : vector<2x32xf32>
    %268 = arith.divf %266, %267 : vector<2x32xf32>
    %269 = vector.extract_strided_slice %251 {offsets = [0, 64], sizes = [2, 32], strides = [1, 1]} : vector<2x96xf32> to vector<2x32xf32>
    %270 = vector.extract_strided_slice %252 {offsets = [0, 64], sizes = [2, 32], strides = [1, 1]} : vector<2x96xf32> to vector<2x32xf32>
    %271 = vector.broadcast %67 : vector<1x32xf32> to vector<2x32xf32>
    %272 = arith.addf %270, %271 : vector<2x32xf32>
    %273 = arith.mulf %260, %272 : vector<2x32xf32>
    %274 = arith.addf %269, %273 : vector<2x32xf32>
    %275 = math.tanh %274 : vector<2x32xf32>
    %cst_101 = arith.constant 1.000000e+00 : f32
    %276 = vector.broadcast %cst_101 : f32 to vector<2x32xf32>
    %277 = arith.subf %276, %268 : vector<2x32xf32>
    %278 = arith.mulf %277, %275 : vector<2x32xf32>
    %279 = arith.mulf %268, %244 : vector<2x32xf32>
    %280 = arith.addf %278, %279 : vector<2x32xf32>
    %281 = arith.index_cast %c5_i32 : i32 to index
    %c0_102 = arith.constant 0 : index
    %c0_103 = arith.constant 0 : index
    %282 = vector.load %arg12[%281, %c0_102, %c0_103] : memref<8x2x32xf32, #tpu.memory_space<vmem>>, vector<1x2x32xf32>
    %283 = vector.shape_cast %282 : vector<1x2x32xf32> to vector<2x32xf32>
    %284 = vector.shape_cast %280 : vector<2x32xf32> to vector<1x2x32xf32>
    tpu.vector_store %arg12[%281, %c0_102, %c0_103], %284 {strides = array<i32>} : memref<8x2x32xf32, #tpu.memory_space<vmem>>, vector<1x2x32xf32>,
    %c6_i32 = arith.constant 6 : i32
    %285 = arith.index_cast %c6_i32 : i32 to index
    %c0_104 = arith.constant 0 : index
    %c0_105 = arith.constant 0 : index
    %286 = vector.load %arg13[%285, %c0_104, %c0_105] : memref<8x2x96xf32, #tpu.memory_space<vmem>>, vector<1x2x96xf32>
    %287 = vector.shape_cast %286 : vector<1x2x96xf32> to vector<2x96xf32>
    %cst_106 = arith.constant dense<0.000000e+00> : vector<2x96xf32>
    %288 = tpu.matmul %280, %66, %cst_106 {dimension_numbers = #tpu.dot_dimension_numbers<[1], [0], [0], [1], [0, 0, 1, 1], [], []>} : vector<2x32xf32>, vector<32x96xf32>, vector<2x96xf32> -> vector<2x96xf32>
    %289 = vector.extract_strided_slice %287 {offsets = [0, 0], sizes = [2, 32], strides = [1, 1]} : vector<2x96xf32> to vector<2x32xf32>
    %290 = vector.extract_strided_slice %288 {offsets = [0, 0], sizes = [2, 32], strides = [1, 1]} : vector<2x96xf32> to vector<2x32xf32>
    %291 = arith.addf %289, %290 : vector<2x32xf32>
    %292 = arith.negf %291 : vector<2x32xf32>
    %293 = math.exp %292 : vector<2x32xf32>
    %cst_107 = arith.constant 1.000000e+00 : f32
    %294 = vector.broadcast %cst_107 : f32 to vector<2x32xf32>
    %295 = arith.addf %294, %293 : vector<2x32xf32>
    %296 = arith.divf %294, %295 : vector<2x32xf32>
    %297 = vector.extract_strided_slice %287 {offsets = [0, 32], sizes = [2, 32], strides = [1, 1]} : vector<2x96xf32> to vector<2x32xf32>
    %298 = vector.extract_strided_slice %288 {offsets = [0, 32], sizes = [2, 32], strides = [1, 1]} : vector<2x96xf32> to vector<2x32xf32>
    %299 = arith.addf %297, %298 : vector<2x32xf32>
    %300 = arith.negf %299 : vector<2x32xf32>
    %301 = math.exp %300 : vector<2x32xf32>
    %cst_108 = arith.constant 1.000000e+00 : f32
    %302 = vector.broadcast %cst_108 : f32 to vector<2x32xf32>
    %303 = arith.addf %302, %301 : vector<2x32xf32>
    %304 = arith.divf %302, %303 : vector<2x32xf32>
    %305 = vector.extract_strided_slice %287 {offsets = [0, 64], sizes = [2, 32], strides = [1, 1]} : vector<2x96xf32> to vector<2x32xf32>
    %306 = vector.extract_strided_slice %288 {offsets = [0, 64], sizes = [2, 32], strides = [1, 1]} : vector<2x96xf32> to vector<2x32xf32>
    %307 = vector.broadcast %67 : vector<1x32xf32> to vector<2x32xf32>
    %308 = arith.addf %306, %307 : vector<2x32xf32>
    %309 = arith.mulf %296, %308 : vector<2x32xf32>
    %310 = arith.addf %305, %309 : vector<2x32xf32>
    %311 = math.tanh %310 : vector<2x32xf32>
    %cst_109 = arith.constant 1.000000e+00 : f32
    %312 = vector.broadcast %cst_109 : f32 to vector<2x32xf32>
    %313 = arith.subf %312, %304 : vector<2x32xf32>
    %314 = arith.mulf %313, %311 : vector<2x32xf32>
    %315 = arith.mulf %304, %280 : vector<2x32xf32>
    %316 = arith.addf %314, %315 : vector<2x32xf32>
    %317 = arith.index_cast %c6_i32 : i32 to index
    %c0_110 = arith.constant 0 : index
    %c0_111 = arith.constant 0 : index
    %318 = vector.load %arg12[%317, %c0_110, %c0_111] : memref<8x2x32xf32, #tpu.memory_space<vmem>>, vector<1x2x32xf32>
    %319 = vector.shape_cast %318 : vector<1x2x32xf32> to vector<2x32xf32>
    %320 = vector.shape_cast %316 : vector<2x32xf32> to vector<1x2x32xf32>
    tpu.vector_store %arg12[%317, %c0_110, %c0_111], %320 {strides = array<i32>} : memref<8x2x32xf32, #tpu.memory_space<vmem>>, vector<1x2x32xf32>,
    %c7_i32 = arith.constant 7 : i32
    %321 = arith.index_cast %c7_i32 : i32 to index
    %c0_112 = arith.constant 0 : index
    %c0_113 = arith.constant 0 : index
    %322 = vector.load %arg13[%321, %c0_112, %c0_113] : memref<8x2x96xf32, #tpu.memory_space<vmem>>, vector<1x2x96xf32>
    %323 = vector.shape_cast %322 : vector<1x2x96xf32> to vector<2x96xf32>
    %cst_114 = arith.constant dense<0.000000e+00> : vector<2x96xf32>
    %324 = tpu.matmul %316, %66, %cst_114 {dimension_numbers = #tpu.dot_dimension_numbers<[1], [0], [0], [1], [0, 0, 1, 1], [], []>} : vector<2x32xf32>, vector<32x96xf32>, vector<2x96xf32> -> vector<2x96xf32>
    %325 = vector.extract_strided_slice %323 {offsets = [0, 0], sizes = [2, 32], strides = [1, 1]} : vector<2x96xf32> to vector<2x32xf32>
    %326 = vector.extract_strided_slice %324 {offsets = [0, 0], sizes = [2, 32], strides = [1, 1]} : vector<2x96xf32> to vector<2x32xf32>
    %327 = arith.addf %325, %326 : vector<2x32xf32>
    %328 = arith.negf %327 : vector<2x32xf32>
    %329 = math.exp %328 : vector<2x32xf32>
    %cst_115 = arith.constant 1.000000e+00 : f32
    %330 = vector.broadcast %cst_115 : f32 to vector<2x32xf32>
    %331 = arith.addf %330, %329 : vector<2x32xf32>
    %332 = arith.divf %330, %331 : vector<2x32xf32>
    %333 = vector.extract_strided_slice %323 {offsets = [0, 32], sizes = [2, 32], strides = [1, 1]} : vector<2x96xf32> to vector<2x32xf32>
    %334 = vector.extract_strided_slice %324 {offsets = [0, 32], sizes = [2, 32], strides = [1, 1]} : vector<2x96xf32> to vector<2x32xf32>
    %335 = arith.addf %333, %334 : vector<2x32xf32>
    %336 = arith.negf %335 : vector<2x32xf32>
    %337 = math.exp %336 : vector<2x32xf32>
    %cst_116 = arith.constant 1.000000e+00 : f32
    %338 = vector.broadcast %cst_116 : f32 to vector<2x32xf32>
    %339 = arith.addf %338, %337 : vector<2x32xf32>
    %340 = arith.divf %338, %339 : vector<2x32xf32>
    %341 = vector.extract_strided_slice %323 {offsets = [0, 64], sizes = [2, 32], strides = [1, 1]} : vector<2x96xf32> to vector<2x32xf32>
    %342 = vector.extract_strided_slice %324 {offsets = [0, 64], sizes = [2, 32], strides = [1, 1]} : vector<2x96xf32> to vector<2x32xf32>
    %343 = vector.broadcast %67 : vector<1x32xf32> to vector<2x32xf32>
    %344 = arith.addf %342, %343 : vector<2x32xf32>
    %345 = arith.mulf %332, %344 : vector<2x32xf32>
    %346 = arith.addf %341, %345 : vector<2x32xf32>
    %347 = math.tanh %346 : vector<2x32xf32>
    %cst_117 = arith.constant 1.000000e+00 : f32
    %348 = vector.broadcast %cst_117 : f32 to vector<2x32xf32>
    %349 = arith.subf %348, %340 : vector<2x32xf32>
    %350 = arith.mulf %349, %347 : vector<2x32xf32>
    %351 = arith.mulf %340, %316 : vector<2x32xf32>
    %352 = arith.addf %350, %351 : vector<2x32xf32>
    %353 = arith.index_cast %c7_i32 : i32 to index
    %c0_118 = arith.constant 0 : index
    %c0_119 = arith.constant 0 : index
    %354 = vector.load %arg12[%353, %c0_118, %c0_119] : memref<8x2x32xf32, #tpu.memory_space<vmem>>, vector<1x2x32xf32>
    %355 = vector.shape_cast %354 : vector<1x2x32xf32> to vector<2x32xf32>
    %356 = vector.shape_cast %352 : vector<2x32xf32> to vector<1x2x32xf32>
    tpu.vector_store %arg12[%353, %c0_118, %c0_119], %356 {strides = array<i32>} : memref<8x2x32xf32, #tpu.memory_space<vmem>>, vector<1x2x32xf32>,
    %c8_i32 = arith.constant 8 : i32
    %c0_120 = arith.constant 0 : index
    %c0_121 = arith.constant 0 : index
    %357 = vector.load %arg5[%c0_120, %c0_121] : memref<32x96xf32, #tpu.memory_space<vmem>>, vector<32x96xf32>
    %c0_122 = arith.constant 0 : index
    %c0_123 = arith.constant 0 : index
    %358 = vector.load %arg7[%c0_122, %c0_123] : memref<1x96xf32, #tpu.memory_space<vmem>>, vector<1x96xf32>
    %c0_124 = arith.constant 0 : index
    %c0_125 = arith.constant 0 : index
    %c0_126 = arith.constant 0 : index
    %359 = vector.load %arg12[%c0_124, %c0_125, %c0_126] : memref<8x2x32xf32, #tpu.memory_space<vmem>>, vector<1x2x32xf32>
    %360 = vector.shape_cast %359 : vector<1x2x32xf32> to vector<2x32xf32>
    %cst_127 = arith.constant dense<0.000000e+00> : vector<2x96xf32>
    %361 = tpu.matmul %360, %357, %cst_127 {dimension_numbers = #tpu.dot_dimension_numbers<[1], [0], [0], [1], [0, 0, 1, 1], [], []>} : vector<2x32xf32>, vector<32x96xf32>, vector<2x96xf32> -> vector<2x96xf32>
    %362 = vector.broadcast %358 : vector<1x96xf32> to vector<2x96xf32>
    %363 = arith.addf %361, %362 : vector<2x96xf32>
    %c0_128 = arith.constant 0 : index
    %c0_129 = arith.constant 0 : index
    %c0_130 = arith.constant 0 : index
    %364 = vector.load %arg13[%c0_128, %c0_129, %c0_130] : memref<8x2x96xf32, #tpu.memory_space<vmem>>, vector<1x2x96xf32>
    %365 = vector.shape_cast %364 : vector<1x2x96xf32> to vector<2x96xf32>
    %366 = vector.shape_cast %363 : vector<2x96xf32> to vector<1x2x96xf32>
    tpu.vector_store %arg13[%c0_128, %c0_129, %c0_130], %366 {strides = array<i32>} : memref<8x2x96xf32, #tpu.memory_space<vmem>>, vector<1x2x96xf32>,
    %c1_131 = arith.constant 1 : index
    %c0_132 = arith.constant 0 : index
    %c0_133 = arith.constant 0 : index
    %367 = vector.load %arg12[%c1_131, %c0_132, %c0_133] : memref<8x2x32xf32, #tpu.memory_space<vmem>>, vector<1x2x32xf32>
    %368 = vector.shape_cast %367 : vector<1x2x32xf32> to vector<2x32xf32>
    %cst_134 = arith.constant dense<0.000000e+00> : vector<2x96xf32>
    %369 = tpu.matmul %368, %357, %cst_134 {dimension_numbers = #tpu.dot_dimension_numbers<[1], [0], [0], [1], [0, 0, 1, 1], [], []>} : vector<2x32xf32>, vector<32x96xf32>, vector<2x96xf32> -> vector<2x96xf32>
    %370 = vector.broadcast %358 : vector<1x96xf32> to vector<2x96xf32>
    %371 = arith.addf %369, %370 : vector<2x96xf32>
    %c1_135 = arith.constant 1 : index
    %c0_136 = arith.constant 0 : index
    %c0_137 = arith.constant 0 : index
    %372 = vector.load %arg13[%c1_135, %c0_136, %c0_137] : memref<8x2x96xf32, #tpu.memory_space<vmem>>, vector<1x2x96xf32>
    %373 = vector.shape_cast %372 : vector<1x2x96xf32> to vector<2x96xf32>
    %374 = vector.shape_cast %371 : vector<2x96xf32> to vector<1x2x96xf32>
    tpu.vector_store %arg13[%c1_135, %c0_136, %c0_137], %374 {strides = array<i32>} : memref<8x2x96xf32, #tpu.memory_space<vmem>>, vector<1x2x96xf32>,
    %c2_138 = arith.constant 2 : index
    %c0_139 = arith.constant 0 : index
    %c0_140 = arith.constant 0 : index
    %375 = vector.load %arg12[%c2_138, %c0_139, %c0_140] : memref<8x2x32xf32, #tpu.memory_space<vmem>>, vector<1x2x32xf32>
    %376 = vector.shape_cast %375 : vector<1x2x32xf32> to vector<2x32xf32>
    %cst_141 = arith.constant dense<0.000000e+00> : vector<2x96xf32>
    %377 = tpu.matmul %376, %357, %cst_141 {dimension_numbers = #tpu.dot_dimension_numbers<[1], [0], [0], [1], [0, 0, 1, 1], [], []>} : vector<2x32xf32>, vector<32x96xf32>, vector<2x96xf32> -> vector<2x96xf32>
    %378 = vector.broadcast %358 : vector<1x96xf32> to vector<2x96xf32>
    %379 = arith.addf %377, %378 : vector<2x96xf32>
    %c2_142 = arith.constant 2 : index
    %c0_143 = arith.constant 0 : index
    %c0_144 = arith.constant 0 : index
    %380 = vector.load %arg13[%c2_142, %c0_143, %c0_144] : memref<8x2x96xf32, #tpu.memory_space<vmem>>, vector<1x2x96xf32>
    %381 = vector.shape_cast %380 : vector<1x2x96xf32> to vector<2x96xf32>
    %382 = vector.shape_cast %379 : vector<2x96xf32> to vector<1x2x96xf32>
    tpu.vector_store %arg13[%c2_142, %c0_143, %c0_144], %382 {strides = array<i32>} : memref<8x2x96xf32, #tpu.memory_space<vmem>>, vector<1x2x96xf32>,
    %c3_145 = arith.constant 3 : index
    %c0_146 = arith.constant 0 : index
    %c0_147 = arith.constant 0 : index
    %383 = vector.load %arg12[%c3_145, %c0_146, %c0_147] : memref<8x2x32xf32, #tpu.memory_space<vmem>>, vector<1x2x32xf32>
    %384 = vector.shape_cast %383 : vector<1x2x32xf32> to vector<2x32xf32>
    %cst_148 = arith.constant dense<0.000000e+00> : vector<2x96xf32>
    %385 = tpu.matmul %384, %357, %cst_148 {dimension_numbers = #tpu.dot_dimension_numbers<[1], [0], [0], [1], [0, 0, 1, 1], [], []>} : vector<2x32xf32>, vector<32x96xf32>, vector<2x96xf32> -> vector<2x96xf32>
    %386 = vector.broadcast %358 : vector<1x96xf32> to vector<2x96xf32>
    %387 = arith.addf %385, %386 : vector<2x96xf32>
    %c3_149 = arith.constant 3 : index
    %c0_150 = arith.constant 0 : index
    %c0_151 = arith.constant 0 : index
    %388 = vector.load %arg13[%c3_149, %c0_150, %c0_151] : memref<8x2x96xf32, #tpu.memory_space<vmem>>, vector<1x2x96xf32>
    %389 = vector.shape_cast %388 : vector<1x2x96xf32> to vector<2x96xf32>
    %390 = vector.shape_cast %387 : vector<2x96xf32> to vector<1x2x96xf32>
    tpu.vector_store %arg13[%c3_149, %c0_150, %c0_151], %390 {strides = array<i32>} : memref<8x2x96xf32, #tpu.memory_space<vmem>>, vector<1x2x96xf32>,
    %c4_152 = arith.constant 4 : index
    %c0_153 = arith.constant 0 : index
    %c0_154 = arith.constant 0 : index
    %391 = vector.load %arg12[%c4_152, %c0_153, %c0_154] : memref<8x2x32xf32, #tpu.memory_space<vmem>>, vector<1x2x32xf32>
    %392 = vector.shape_cast %391 : vector<1x2x32xf32> to vector<2x32xf32>
    %cst_155 = arith.constant dense<0.000000e+00> : vector<2x96xf32>
    %393 = tpu.matmul %392, %357, %cst_155 {dimension_numbers = #tpu.dot_dimension_numbers<[1], [0], [0], [1], [0, 0, 1, 1], [], []>} : vector<2x32xf32>, vector<32x96xf32>, vector<2x96xf32> -> vector<2x96xf32>
    %394 = vector.broadcast %358 : vector<1x96xf32> to vector<2x96xf32>
    %395 = arith.addf %393, %394 : vector<2x96xf32>
    %c4_156 = arith.constant 4 : index
    %c0_157 = arith.constant 0 : index
    %c0_158 = arith.constant 0 : index
    %396 = vector.load %arg13[%c4_156, %c0_157, %c0_158] : memref<8x2x96xf32, #tpu.memory_space<vmem>>, vector<1x2x96xf32>
    %397 = vector.shape_cast %396 : vector<1x2x96xf32> to vector<2x96xf32>
    %398 = vector.shape_cast %395 : vector<2x96xf32> to vector<1x2x96xf32>
    tpu.vector_store %arg13[%c4_156, %c0_157, %c0_158], %398 {strides = array<i32>} : memref<8x2x96xf32, #tpu.memory_space<vmem>>, vector<1x2x96xf32>,
    %c5_159 = arith.constant 5 : index
    %c0_160 = arith.constant 0 : index
    %c0_161 = arith.constant 0 : index
    %399 = vector.load %arg12[%c5_159, %c0_160, %c0_161] : memref<8x2x32xf32, #tpu.memory_space<vmem>>, vector<1x2x32xf32>
    %400 = vector.shape_cast %399 : vector<1x2x32xf32> to vector<2x32xf32>
    %cst_162 = arith.constant dense<0.000000e+00> : vector<2x96xf32>
    %401 = tpu.matmul %400, %357, %cst_162 {dimension_numbers = #tpu.dot_dimension_numbers<[1], [0], [0], [1], [0, 0, 1, 1], [], []>} : vector<2x32xf32>, vector<32x96xf32>, vector<2x96xf32> -> vector<2x96xf32>
    %402 = vector.broadcast %358 : vector<1x96xf32> to vector<2x96xf32>
    %403 = arith.addf %401, %402 : vector<2x96xf32>
    %c5_163 = arith.constant 5 : index
    %c0_164 = arith.constant 0 : index
    %c0_165 = arith.constant 0 : index
    %404 = vector.load %arg13[%c5_163, %c0_164, %c0_165] : memref<8x2x96xf32, #tpu.memory_space<vmem>>, vector<1x2x96xf32>
    %405 = vector.shape_cast %404 : vector<1x2x96xf32> to vector<2x96xf32>
    %406 = vector.shape_cast %403 : vector<2x96xf32> to vector<1x2x96xf32>
    tpu.vector_store %arg13[%c5_163, %c0_164, %c0_165], %406 {strides = array<i32>} : memref<8x2x96xf32, #tpu.memory_space<vmem>>, vector<1x2x96xf32>,
    %c6_166 = arith.constant 6 : index
    %c0_167 = arith.constant 0 : index
    %c0_168 = arith.constant 0 : index
    %407 = vector.load %arg12[%c6_166, %c0_167, %c0_168] : memref<8x2x32xf32, #tpu.memory_space<vmem>>, vector<1x2x32xf32>
    %408 = vector.shape_cast %407 : vector<1x2x32xf32> to vector<2x32xf32>
    %cst_169 = arith.constant dense<0.000000e+00> : vector<2x96xf32>
    %409 = tpu.matmul %408, %357, %cst_169 {dimension_numbers = #tpu.dot_dimension_numbers<[1], [0], [0], [1], [0, 0, 1, 1], [], []>} : vector<2x32xf32>, vector<32x96xf32>, vector<2x96xf32> -> vector<2x96xf32>
    %410 = vector.broadcast %358 : vector<1x96xf32> to vector<2x96xf32>
    %411 = arith.addf %409, %410 : vector<2x96xf32>
    %c6_170 = arith.constant 6 : index
    %c0_171 = arith.constant 0 : index
    %c0_172 = arith.constant 0 : index
    %412 = vector.load %arg13[%c6_170, %c0_171, %c0_172] : memref<8x2x96xf32, #tpu.memory_space<vmem>>, vector<1x2x96xf32>
    %413 = vector.shape_cast %412 : vector<1x2x96xf32> to vector<2x96xf32>
    %414 = vector.shape_cast %411 : vector<2x96xf32> to vector<1x2x96xf32>
    tpu.vector_store %arg13[%c6_170, %c0_171, %c0_172], %414 {strides = array<i32>} : memref<8x2x96xf32, #tpu.memory_space<vmem>>, vector<1x2x96xf32>,
    %c7_173 = arith.constant 7 : index
    %c0_174 = arith.constant 0 : index
    %c0_175 = arith.constant 0 : index
    %415 = vector.load %arg12[%c7_173, %c0_174, %c0_175] : memref<8x2x32xf32, #tpu.memory_space<vmem>>, vector<1x2x32xf32>
    %416 = vector.shape_cast %415 : vector<1x2x32xf32> to vector<2x32xf32>
    %cst_176 = arith.constant dense<0.000000e+00> : vector<2x96xf32>
    %417 = tpu.matmul %416, %357, %cst_176 {dimension_numbers = #tpu.dot_dimension_numbers<[1], [0], [0], [1], [0, 0, 1, 1], [], []>} : vector<2x32xf32>, vector<32x96xf32>, vector<2x96xf32> -> vector<2x96xf32>
    %418 = vector.broadcast %358 : vector<1x96xf32> to vector<2x96xf32>
    %419 = arith.addf %417, %418 : vector<2x96xf32>
    %c7_177 = arith.constant 7 : index
    %c0_178 = arith.constant 0 : index
    %c0_179 = arith.constant 0 : index
    %420 = vector.load %arg13[%c7_177, %c0_178, %c0_179] : memref<8x2x96xf32, #tpu.memory_space<vmem>>, vector<1x2x96xf32>
    %421 = vector.shape_cast %420 : vector<1x2x96xf32> to vector<2x96xf32>
    %422 = vector.shape_cast %419 : vector<2x96xf32> to vector<1x2x96xf32>
    tpu.vector_store %arg13[%c7_177, %c0_178, %c0_179], %422 {strides = array<i32>} : memref<8x2x96xf32, #tpu.memory_space<vmem>>, vector<1x2x96xf32>,
    %c0_180 = arith.constant 0 : index
    %c0_181 = arith.constant 0 : index
    %423 = vector.load %arg6[%c0_180, %c0_181] : memref<32x96xf32, #tpu.memory_space<vmem>>, vector<32x96xf32>
    %c0_182 = arith.constant 0 : index
    %c0_183 = arith.constant 0 : index
    %424 = vector.load %arg8[%c0_182, %c0_183] : memref<1x32xf32, #tpu.memory_space<vmem>>, vector<1x32xf32>
    %cst_184 = arith.constant 0.000000e+00 : f32
    %425 = vector.broadcast %cst_184 : f32 to vector<2x32xf32>
    %c0_i32_185 = arith.constant 0 : i32
    %426 = arith.index_cast %c0_i32_185 : i32 to index
    %c0_186 = arith.constant 0 : index
    %c0_187 = arith.constant 0 : index
    %427 = vector.load %arg13[%426, %c0_186, %c0_187] : memref<8x2x96xf32, #tpu.memory_space<vmem>>, vector<1x2x96xf32>
    %428 = vector.shape_cast %427 : vector<1x2x96xf32> to vector<2x96xf32>
    %cst_188 = arith.constant dense<0.000000e+00> : vector<2x96xf32>
    %429 = tpu.matmul %425, %423, %cst_188 {dimension_numbers = #tpu.dot_dimension_numbers<[1], [0], [0], [1], [0, 0, 1, 1], [], []>} : vector<2x32xf32>, vector<32x96xf32>, vector<2x96xf32> -> vector<2x96xf32>
    %430 = vector.extract_strided_slice %428 {offsets = [0, 0], sizes = [2, 32], strides = [1, 1]} : vector<2x96xf32> to vector<2x32xf32>
    %431 = vector.extract_strided_slice %429 {offsets = [0, 0], sizes = [2, 32], strides = [1, 1]} : vector<2x96xf32> to vector<2x32xf32>
    %432 = arith.addf %430, %431 : vector<2x32xf32>
    %433 = arith.negf %432 : vector<2x32xf32>
    %434 = math.exp %433 : vector<2x32xf32>
    %cst_189 = arith.constant 1.000000e+00 : f32
    %435 = vector.broadcast %cst_189 : f32 to vector<2x32xf32>
    %436 = arith.addf %435, %434 : vector<2x32xf32>
    %437 = arith.divf %435, %436 : vector<2x32xf32>
    %438 = vector.extract_strided_slice %428 {offsets = [0, 32], sizes = [2, 32], strides = [1, 1]} : vector<2x96xf32> to vector<2x32xf32>
    %439 = vector.extract_strided_slice %429 {offsets = [0, 32], sizes = [2, 32], strides = [1, 1]} : vector<2x96xf32> to vector<2x32xf32>
    %440 = arith.addf %438, %439 : vector<2x32xf32>
    %441 = arith.negf %440 : vector<2x32xf32>
    %442 = math.exp %441 : vector<2x32xf32>
    %cst_190 = arith.constant 1.000000e+00 : f32
    %443 = vector.broadcast %cst_190 : f32 to vector<2x32xf32>
    %444 = arith.addf %443, %442 : vector<2x32xf32>
    %445 = arith.divf %443, %444 : vector<2x32xf32>
    %446 = vector.extract_strided_slice %428 {offsets = [0, 64], sizes = [2, 32], strides = [1, 1]} : vector<2x96xf32> to vector<2x32xf32>
    %447 = vector.extract_strided_slice %429 {offsets = [0, 64], sizes = [2, 32], strides = [1, 1]} : vector<2x96xf32> to vector<2x32xf32>
    %448 = vector.broadcast %424 : vector<1x32xf32> to vector<2x32xf32>
    %449 = arith.addf %447, %448 : vector<2x32xf32>
    %450 = arith.mulf %437, %449 : vector<2x32xf32>
    %451 = arith.addf %446, %450 : vector<2x32xf32>
    %452 = math.tanh %451 : vector<2x32xf32>
    %cst_191 = arith.constant 1.000000e+00 : f32
    %453 = vector.broadcast %cst_191 : f32 to vector<2x32xf32>
    %454 = arith.subf %453, %445 : vector<2x32xf32>
    %455 = arith.mulf %454, %452 : vector<2x32xf32>
    %456 = arith.mulf %445, %425 : vector<2x32xf32>
    %457 = arith.addf %455, %456 : vector<2x32xf32>
    %458 = arith.index_cast %c0_i32_185 : i32 to index
    %c0_192 = arith.constant 0 : index
    %c0_193 = arith.constant 0 : index
    %459 = vector.load %arg12[%458, %c0_192, %c0_193] : memref<8x2x32xf32, #tpu.memory_space<vmem>>, vector<1x2x32xf32>
    %460 = vector.shape_cast %459 : vector<1x2x32xf32> to vector<2x32xf32>
    %461 = vector.shape_cast %457 : vector<2x32xf32> to vector<1x2x32xf32>
    tpu.vector_store %arg12[%458, %c0_192, %c0_193], %461 {strides = array<i32>} : memref<8x2x32xf32, #tpu.memory_space<vmem>>, vector<1x2x32xf32>,
    %c1_i32_194 = arith.constant 1 : i32
    %462 = arith.index_cast %c1_i32_194 : i32 to index
    %c0_195 = arith.constant 0 : index
    %c0_196 = arith.constant 0 : index
    %463 = vector.load %arg13[%462, %c0_195, %c0_196] : memref<8x2x96xf32, #tpu.memory_space<vmem>>, vector<1x2x96xf32>
    %464 = vector.shape_cast %463 : vector<1x2x96xf32> to vector<2x96xf32>
    %cst_197 = arith.constant dense<0.000000e+00> : vector<2x96xf32>
    %465 = tpu.matmul %457, %423, %cst_197 {dimension_numbers = #tpu.dot_dimension_numbers<[1], [0], [0], [1], [0, 0, 1, 1], [], []>} : vector<2x32xf32>, vector<32x96xf32>, vector<2x96xf32> -> vector<2x96xf32>
    %466 = vector.extract_strided_slice %464 {offsets = [0, 0], sizes = [2, 32], strides = [1, 1]} : vector<2x96xf32> to vector<2x32xf32>
    %467 = vector.extract_strided_slice %465 {offsets = [0, 0], sizes = [2, 32], strides = [1, 1]} : vector<2x96xf32> to vector<2x32xf32>
    %468 = arith.addf %466, %467 : vector<2x32xf32>
    %469 = arith.negf %468 : vector<2x32xf32>
    %470 = math.exp %469 : vector<2x32xf32>
    %cst_198 = arith.constant 1.000000e+00 : f32
    %471 = vector.broadcast %cst_198 : f32 to vector<2x32xf32>
    %472 = arith.addf %471, %470 : vector<2x32xf32>
    %473 = arith.divf %471, %472 : vector<2x32xf32>
    %474 = vector.extract_strided_slice %464 {offsets = [0, 32], sizes = [2, 32], strides = [1, 1]} : vector<2x96xf32> to vector<2x32xf32>
    %475 = vector.extract_strided_slice %465 {offsets = [0, 32], sizes = [2, 32], strides = [1, 1]} : vector<2x96xf32> to vector<2x32xf32>
    %476 = arith.addf %474, %475 : vector<2x32xf32>
    %477 = arith.negf %476 : vector<2x32xf32>
    %478 = math.exp %477 : vector<2x32xf32>
    %cst_199 = arith.constant 1.000000e+00 : f32
    %479 = vector.broadcast %cst_199 : f32 to vector<2x32xf32>
    %480 = arith.addf %479, %478 : vector<2x32xf32>
    %481 = arith.divf %479, %480 : vector<2x32xf32>
    %482 = vector.extract_strided_slice %464 {offsets = [0, 64], sizes = [2, 32], strides = [1, 1]} : vector<2x96xf32> to vector<2x32xf32>
    %483 = vector.extract_strided_slice %465 {offsets = [0, 64], sizes = [2, 32], strides = [1, 1]} : vector<2x96xf32> to vector<2x32xf32>
    %484 = vector.broadcast %424 : vector<1x32xf32> to vector<2x32xf32>
    %485 = arith.addf %483, %484 : vector<2x32xf32>
    %486 = arith.mulf %473, %485 : vector<2x32xf32>
    %487 = arith.addf %482, %486 : vector<2x32xf32>
    %488 = math.tanh %487 : vector<2x32xf32>
    %cst_200 = arith.constant 1.000000e+00 : f32
    %489 = vector.broadcast %cst_200 : f32 to vector<2x32xf32>
    %490 = arith.subf %489, %481 : vector<2x32xf32>
    %491 = arith.mulf %490, %488 : vector<2x32xf32>
    %492 = arith.mulf %481, %457 : vector<2x32xf32>
    %493 = arith.addf %491, %492 : vector<2x32xf32>
    %494 = arith.index_cast %c1_i32_194 : i32 to index
    %c0_201 = arith.constant 0 : index
    %c0_202 = arith.constant 0 : index
    %495 = vector.load %arg12[%494, %c0_201, %c0_202] : memref<8x2x32xf32, #tpu.memory_space<vmem>>, vector<1x2x32xf32>
    %496 = vector.shape_cast %495 : vector<1x2x32xf32> to vector<2x32xf32>
    %497 = vector.shape_cast %493 : vector<2x32xf32> to vector<1x2x32xf32>
    tpu.vector_store %arg12[%494, %c0_201, %c0_202], %497 {strides = array<i32>} : memref<8x2x32xf32, #tpu.memory_space<vmem>>, vector<1x2x32xf32>,
    %c2_i32_203 = arith.constant 2 : i32
    %498 = arith.index_cast %c2_i32_203 : i32 to index
    %c0_204 = arith.constant 0 : index
    %c0_205 = arith.constant 0 : index
    %499 = vector.load %arg13[%498, %c0_204, %c0_205] : memref<8x2x96xf32, #tpu.memory_space<vmem>>, vector<1x2x96xf32>
    %500 = vector.shape_cast %499 : vector<1x2x96xf32> to vector<2x96xf32>
    %cst_206 = arith.constant dense<0.000000e+00> : vector<2x96xf32>
    %501 = tpu.matmul %493, %423, %cst_206 {dimension_numbers = #tpu.dot_dimension_numbers<[1], [0], [0], [1], [0, 0, 1, 1], [], []>} : vector<2x32xf32>, vector<32x96xf32>, vector<2x96xf32> -> vector<2x96xf32>
    %502 = vector.extract_strided_slice %500 {offsets = [0, 0], sizes = [2, 32], strides = [1, 1]} : vector<2x96xf32> to vector<2x32xf32>
    %503 = vector.extract_strided_slice %501 {offsets = [0, 0], sizes = [2, 32], strides = [1, 1]} : vector<2x96xf32> to vector<2x32xf32>
    %504 = arith.addf %502, %503 : vector<2x32xf32>
    %505 = arith.negf %504 : vector<2x32xf32>
    %506 = math.exp %505 : vector<2x32xf32>
    %cst_207 = arith.constant 1.000000e+00 : f32
    %507 = vector.broadcast %cst_207 : f32 to vector<2x32xf32>
    %508 = arith.addf %507, %506 : vector<2x32xf32>
    %509 = arith.divf %507, %508 : vector<2x32xf32>
    %510 = vector.extract_strided_slice %500 {offsets = [0, 32], sizes = [2, 32], strides = [1, 1]} : vector<2x96xf32> to vector<2x32xf32>
    %511 = vector.extract_strided_slice %501 {offsets = [0, 32], sizes = [2, 32], strides = [1, 1]} : vector<2x96xf32> to vector<2x32xf32>
    %512 = arith.addf %510, %511 : vector<2x32xf32>
    %513 = arith.negf %512 : vector<2x32xf32>
    %514 = math.exp %513 : vector<2x32xf32>
    %cst_208 = arith.constant 1.000000e+00 : f32
    %515 = vector.broadcast %cst_208 : f32 to vector<2x32xf32>
    %516 = arith.addf %515, %514 : vector<2x32xf32>
    %517 = arith.divf %515, %516 : vector<2x32xf32>
    %518 = vector.extract_strided_slice %500 {offsets = [0, 64], sizes = [2, 32], strides = [1, 1]} : vector<2x96xf32> to vector<2x32xf32>
    %519 = vector.extract_strided_slice %501 {offsets = [0, 64], sizes = [2, 32], strides = [1, 1]} : vector<2x96xf32> to vector<2x32xf32>
    %520 = vector.broadcast %424 : vector<1x32xf32> to vector<2x32xf32>
    %521 = arith.addf %519, %520 : vector<2x32xf32>
    %522 = arith.mulf %509, %521 : vector<2x32xf32>
    %523 = arith.addf %518, %522 : vector<2x32xf32>
    %524 = math.tanh %523 : vector<2x32xf32>
    %cst_209 = arith.constant 1.000000e+00 : f32
    %525 = vector.broadcast %cst_209 : f32 to vector<2x32xf32>
    %526 = arith.subf %525, %517 : vector<2x32xf32>
    %527 = arith.mulf %526, %524 : vector<2x32xf32>
    %528 = arith.mulf %517, %493 : vector<2x32xf32>
    %529 = arith.addf %527, %528 : vector<2x32xf32>
    %530 = arith.index_cast %c2_i32_203 : i32 to index
    %c0_210 = arith.constant 0 : index
    %c0_211 = arith.constant 0 : index
    %531 = vector.load %arg12[%530, %c0_210, %c0_211] : memref<8x2x32xf32, #tpu.memory_space<vmem>>, vector<1x2x32xf32>
    %532 = vector.shape_cast %531 : vector<1x2x32xf32> to vector<2x32xf32>
    %533 = vector.shape_cast %529 : vector<2x32xf32> to vector<1x2x32xf32>
    tpu.vector_store %arg12[%530, %c0_210, %c0_211], %533 {strides = array<i32>} : memref<8x2x32xf32, #tpu.memory_space<vmem>>, vector<1x2x32xf32>,
    %c3_i32_212 = arith.constant 3 : i32
    %534 = arith.index_cast %c3_i32_212 : i32 to index
    %c0_213 = arith.constant 0 : index
    %c0_214 = arith.constant 0 : index
    %535 = vector.load %arg13[%534, %c0_213, %c0_214] : memref<8x2x96xf32, #tpu.memory_space<vmem>>, vector<1x2x96xf32>
    %536 = vector.shape_cast %535 : vector<1x2x96xf32> to vector<2x96xf32>
    %cst_215 = arith.constant dense<0.000000e+00> : vector<2x96xf32>
    %537 = tpu.matmul %529, %423, %cst_215 {dimension_numbers = #tpu.dot_dimension_numbers<[1], [0], [0], [1], [0, 0, 1, 1], [], []>} : vector<2x32xf32>, vector<32x96xf32>, vector<2x96xf32> -> vector<2x96xf32>
    %538 = vector.extract_strided_slice %536 {offsets = [0, 0], sizes = [2, 32], strides = [1, 1]} : vector<2x96xf32> to vector<2x32xf32>
    %539 = vector.extract_strided_slice %537 {offsets = [0, 0], sizes = [2, 32], strides = [1, 1]} : vector<2x96xf32> to vector<2x32xf32>
    %540 = arith.addf %538, %539 : vector<2x32xf32>
    %541 = arith.negf %540 : vector<2x32xf32>
    %542 = math.exp %541 : vector<2x32xf32>
    %cst_216 = arith.constant 1.000000e+00 : f32
    %543 = vector.broadcast %cst_216 : f32 to vector<2x32xf32>
    %544 = arith.addf %543, %542 : vector<2x32xf32>
    %545 = arith.divf %543, %544 : vector<2x32xf32>
    %546 = vector.extract_strided_slice %536 {offsets = [0, 32], sizes = [2, 32], strides = [1, 1]} : vector<2x96xf32> to vector<2x32xf32>
    %547 = vector.extract_strided_slice %537 {offsets = [0, 32], sizes = [2, 32], strides = [1, 1]} : vector<2x96xf32> to vector<2x32xf32>
    %548 = arith.addf %546, %547 : vector<2x32xf32>
    %549 = arith.negf %548 : vector<2x32xf32>
    %550 = math.exp %549 : vector<2x32xf32>
    %cst_217 = arith.constant 1.000000e+00 : f32
    %551 = vector.broadcast %cst_217 : f32 to vector<2x32xf32>
    %552 = arith.addf %551, %550 : vector<2x32xf32>
    %553 = arith.divf %551, %552 : vector<2x32xf32>
    %554 = vector.extract_strided_slice %536 {offsets = [0, 64], sizes = [2, 32], strides = [1, 1]} : vector<2x96xf32> to vector<2x32xf32>
    %555 = vector.extract_strided_slice %537 {offsets = [0, 64], sizes = [2, 32], strides = [1, 1]} : vector<2x96xf32> to vector<2x32xf32>
    %556 = vector.broadcast %424 : vector<1x32xf32> to vector<2x32xf32>
    %557 = arith.addf %555, %556 : vector<2x32xf32>
    %558 = arith.mulf %545, %557 : vector<2x32xf32>
    %559 = arith.addf %554, %558 : vector<2x32xf32>
    %560 = math.tanh %559 : vector<2x32xf32>
    %cst_218 = arith.constant 1.000000e+00 : f32
    %561 = vector.broadcast %cst_218 : f32 to vector<2x32xf32>
    %562 = arith.subf %561, %553 : vector<2x32xf32>
    %563 = arith.mulf %562, %560 : vector<2x32xf32>
    %564 = arith.mulf %553, %529 : vector<2x32xf32>
    %565 = arith.addf %563, %564 : vector<2x32xf32>
    %566 = arith.index_cast %c3_i32_212 : i32 to index
    %c0_219 = arith.constant 0 : index
    %c0_220 = arith.constant 0 : index
    %567 = vector.load %arg12[%566, %c0_219, %c0_220] : memref<8x2x32xf32, #tpu.memory_space<vmem>>, vector<1x2x32xf32>
    %568 = vector.shape_cast %567 : vector<1x2x32xf32> to vector<2x32xf32>
    %569 = vector.shape_cast %565 : vector<2x32xf32> to vector<1x2x32xf32>
    tpu.vector_store %arg12[%566, %c0_219, %c0_220], %569 {strides = array<i32>} : memref<8x2x32xf32, #tpu.memory_space<vmem>>, vector<1x2x32xf32>,
    %c4_i32_221 = arith.constant 4 : i32
    %570 = arith.index_cast %c4_i32_221 : i32 to index
    %c0_222 = arith.constant 0 : index
    %c0_223 = arith.constant 0 : index
    %571 = vector.load %arg13[%570, %c0_222, %c0_223] : memref<8x2x96xf32, #tpu.memory_space<vmem>>, vector<1x2x96xf32>
    %572 = vector.shape_cast %571 : vector<1x2x96xf32> to vector<2x96xf32>
    %cst_224 = arith.constant dense<0.000000e+00> : vector<2x96xf32>
    %573 = tpu.matmul %565, %423, %cst_224 {dimension_numbers = #tpu.dot_dimension_numbers<[1], [0], [0], [1], [0, 0, 1, 1], [], []>} : vector<2x32xf32>, vector<32x96xf32>, vector<2x96xf32> -> vector<2x96xf32>
    %574 = vector.extract_strided_slice %572 {offsets = [0, 0], sizes = [2, 32], strides = [1, 1]} : vector<2x96xf32> to vector<2x32xf32>
    %575 = vector.extract_strided_slice %573 {offsets = [0, 0], sizes = [2, 32], strides = [1, 1]} : vector<2x96xf32> to vector<2x32xf32>
    %576 = arith.addf %574, %575 : vector<2x32xf32>
    %577 = arith.negf %576 : vector<2x32xf32>
    %578 = math.exp %577 : vector<2x32xf32>
    %cst_225 = arith.constant 1.000000e+00 : f32
    %579 = vector.broadcast %cst_225 : f32 to vector<2x32xf32>
    %580 = arith.addf %579, %578 : vector<2x32xf32>
    %581 = arith.divf %579, %580 : vector<2x32xf32>
    %582 = vector.extract_strided_slice %572 {offsets = [0, 32], sizes = [2, 32], strides = [1, 1]} : vector<2x96xf32> to vector<2x32xf32>
    %583 = vector.extract_strided_slice %573 {offsets = [0, 32], sizes = [2, 32], strides = [1, 1]} : vector<2x96xf32> to vector<2x32xf32>
    %584 = arith.addf %582, %583 : vector<2x32xf32>
    %585 = arith.negf %584 : vector<2x32xf32>
    %586 = math.exp %585 : vector<2x32xf32>
    %cst_226 = arith.constant 1.000000e+00 : f32
    %587 = vector.broadcast %cst_226 : f32 to vector<2x32xf32>
    %588 = arith.addf %587, %586 : vector<2x32xf32>
    %589 = arith.divf %587, %588 : vector<2x32xf32>
    %590 = vector.extract_strided_slice %572 {offsets = [0, 64], sizes = [2, 32], strides = [1, 1]} : vector<2x96xf32> to vector<2x32xf32>
    %591 = vector.extract_strided_slice %573 {offsets = [0, 64], sizes = [2, 32], strides = [1, 1]} : vector<2x96xf32> to vector<2x32xf32>
    %592 = vector.broadcast %424 : vector<1x32xf32> to vector<2x32xf32>
    %593 = arith.addf %591, %592 : vector<2x32xf32>
    %594 = arith.mulf %581, %593 : vector<2x32xf32>
    %595 = arith.addf %590, %594 : vector<2x32xf32>
    %596 = math.tanh %595 : vector<2x32xf32>
    %cst_227 = arith.constant 1.000000e+00 : f32
    %597 = vector.broadcast %cst_227 : f32 to vector<2x32xf32>
    %598 = arith.subf %597, %589 : vector<2x32xf32>
    %599 = arith.mulf %598, %596 : vector<2x32xf32>
    %600 = arith.mulf %589, %565 : vector<2x32xf32>
    %601 = arith.addf %599, %600 : vector<2x32xf32>
    %602 = arith.index_cast %c4_i32_221 : i32 to index
    %c0_228 = arith.constant 0 : index
    %c0_229 = arith.constant 0 : index
    %603 = vector.load %arg12[%602, %c0_228, %c0_229] : memref<8x2x32xf32, #tpu.memory_space<vmem>>, vector<1x2x32xf32>
    %604 = vector.shape_cast %603 : vector<1x2x32xf32> to vector<2x32xf32>
    %605 = vector.shape_cast %601 : vector<2x32xf32> to vector<1x2x32xf32>
    tpu.vector_store %arg12[%602, %c0_228, %c0_229], %605 {strides = array<i32>} : memref<8x2x32xf32, #tpu.memory_space<vmem>>, vector<1x2x32xf32>,
    %c5_i32_230 = arith.constant 5 : i32
    %606 = arith.index_cast %c5_i32_230 : i32 to index
    %c0_231 = arith.constant 0 : index
    %c0_232 = arith.constant 0 : index
    %607 = vector.load %arg13[%606, %c0_231, %c0_232] : memref<8x2x96xf32, #tpu.memory_space<vmem>>, vector<1x2x96xf32>
    %608 = vector.shape_cast %607 : vector<1x2x96xf32> to vector<2x96xf32>
    %cst_233 = arith.constant dense<0.000000e+00> : vector<2x96xf32>
    %609 = tpu.matmul %601, %423, %cst_233 {dimension_numbers = #tpu.dot_dimension_numbers<[1], [0], [0], [1], [0, 0, 1, 1], [], []>} : vector<2x32xf32>, vector<32x96xf32>, vector<2x96xf32> -> vector<2x96xf32>
    %610 = vector.extract_strided_slice %608 {offsets = [0, 0], sizes = [2, 32], strides = [1, 1]} : vector<2x96xf32> to vector<2x32xf32>
    %611 = vector.extract_strided_slice %609 {offsets = [0, 0], sizes = [2, 32], strides = [1, 1]} : vector<2x96xf32> to vector<2x32xf32>
    %612 = arith.addf %610, %611 : vector<2x32xf32>
    %613 = arith.negf %612 : vector<2x32xf32>
    %614 = math.exp %613 : vector<2x32xf32>
    %cst_234 = arith.constant 1.000000e+00 : f32
    %615 = vector.broadcast %cst_234 : f32 to vector<2x32xf32>
    %616 = arith.addf %615, %614 : vector<2x32xf32>
    %617 = arith.divf %615, %616 : vector<2x32xf32>
    %618 = vector.extract_strided_slice %608 {offsets = [0, 32], sizes = [2, 32], strides = [1, 1]} : vector<2x96xf32> to vector<2x32xf32>
    %619 = vector.extract_strided_slice %609 {offsets = [0, 32], sizes = [2, 32], strides = [1, 1]} : vector<2x96xf32> to vector<2x32xf32>
    %620 = arith.addf %618, %619 : vector<2x32xf32>
    %621 = arith.negf %620 : vector<2x32xf32>
    %622 = math.exp %621 : vector<2x32xf32>
    %cst_235 = arith.constant 1.000000e+00 : f32
    %623 = vector.broadcast %cst_235 : f32 to vector<2x32xf32>
    %624 = arith.addf %623, %622 : vector<2x32xf32>
    %625 = arith.divf %623, %624 : vector<2x32xf32>
    %626 = vector.extract_strided_slice %608 {offsets = [0, 64], sizes = [2, 32], strides = [1, 1]} : vector<2x96xf32> to vector<2x32xf32>
    %627 = vector.extract_strided_slice %609 {offsets = [0, 64], sizes = [2, 32], strides = [1, 1]} : vector<2x96xf32> to vector<2x32xf32>
    %628 = vector.broadcast %424 : vector<1x32xf32> to vector<2x32xf32>
    %629 = arith.addf %627, %628 : vector<2x32xf32>
    %630 = arith.mulf %617, %629 : vector<2x32xf32>
    %631 = arith.addf %626, %630 : vector<2x32xf32>
    %632 = math.tanh %631 : vector<2x32xf32>
    %cst_236 = arith.constant 1.000000e+00 : f32
    %633 = vector.broadcast %cst_236 : f32 to vector<2x32xf32>
    %634 = arith.subf %633, %625 : vector<2x32xf32>
    %635 = arith.mulf %634, %632 : vector<2x32xf32>
    %636 = arith.mulf %625, %601 : vector<2x32xf32>
    %637 = arith.addf %635, %636 : vector<2x32xf32>
    %638 = arith.index_cast %c5_i32_230 : i32 to index
    %c0_237 = arith.constant 0 : index
    %c0_238 = arith.constant 0 : index
    %639 = vector.load %arg12[%638, %c0_237, %c0_238] : memref<8x2x32xf32, #tpu.memory_space<vmem>>, vector<1x2x32xf32>
    %640 = vector.shape_cast %639 : vector<1x2x32xf32> to vector<2x32xf32>
    %641 = vector.shape_cast %637 : vector<2x32xf32> to vector<1x2x32xf32>
    tpu.vector_store %arg12[%638, %c0_237, %c0_238], %641 {strides = array<i32>} : memref<8x2x32xf32, #tpu.memory_space<vmem>>, vector<1x2x32xf32>,
    %c6_i32_239 = arith.constant 6 : i32
    %642 = arith.index_cast %c6_i32_239 : i32 to index
    %c0_240 = arith.constant 0 : index
    %c0_241 = arith.constant 0 : index
    %643 = vector.load %arg13[%642, %c0_240, %c0_241] : memref<8x2x96xf32, #tpu.memory_space<vmem>>, vector<1x2x96xf32>
    %644 = vector.shape_cast %643 : vector<1x2x96xf32> to vector<2x96xf32>
    %cst_242 = arith.constant dense<0.000000e+00> : vector<2x96xf32>
    %645 = tpu.matmul %637, %423, %cst_242 {dimension_numbers = #tpu.dot_dimension_numbers<[1], [0], [0], [1], [0, 0, 1, 1], [], []>} : vector<2x32xf32>, vector<32x96xf32>, vector<2x96xf32> -> vector<2x96xf32>
    %646 = vector.extract_strided_slice %644 {offsets = [0, 0], sizes = [2, 32], strides = [1, 1]} : vector<2x96xf32> to vector<2x32xf32>
    %647 = vector.extract_strided_slice %645 {offsets = [0, 0], sizes = [2, 32], strides = [1, 1]} : vector<2x96xf32> to vector<2x32xf32>
    %648 = arith.addf %646, %647 : vector<2x32xf32>
    %649 = arith.negf %648 : vector<2x32xf32>
    %650 = math.exp %649 : vector<2x32xf32>
    %cst_243 = arith.constant 1.000000e+00 : f32
    %651 = vector.broadcast %cst_243 : f32 to vector<2x32xf32>
    %652 = arith.addf %651, %650 : vector<2x32xf32>
    %653 = arith.divf %651, %652 : vector<2x32xf32>
    %654 = vector.extract_strided_slice %644 {offsets = [0, 32], sizes = [2, 32], strides = [1, 1]} : vector<2x96xf32> to vector<2x32xf32>
    %655 = vector.extract_strided_slice %645 {offsets = [0, 32], sizes = [2, 32], strides = [1, 1]} : vector<2x96xf32> to vector<2x32xf32>
    %656 = arith.addf %654, %655 : vector<2x32xf32>
    %657 = arith.negf %656 : vector<2x32xf32>
    %658 = math.exp %657 : vector<2x32xf32>
    %cst_244 = arith.constant 1.000000e+00 : f32
    %659 = vector.broadcast %cst_244 : f32 to vector<2x32xf32>
    %660 = arith.addf %659, %658 : vector<2x32xf32>
    %661 = arith.divf %659, %660 : vector<2x32xf32>
    %662 = vector.extract_strided_slice %644 {offsets = [0, 64], sizes = [2, 32], strides = [1, 1]} : vector<2x96xf32> to vector<2x32xf32>
    %663 = vector.extract_strided_slice %645 {offsets = [0, 64], sizes = [2, 32], strides = [1, 1]} : vector<2x96xf32> to vector<2x32xf32>
    %664 = vector.broadcast %424 : vector<1x32xf32> to vector<2x32xf32>
    %665 = arith.addf %663, %664 : vector<2x32xf32>
    %666 = arith.mulf %653, %665 : vector<2x32xf32>
    %667 = arith.addf %662, %666 : vector<2x32xf32>
    %668 = math.tanh %667 : vector<2x32xf32>
    %cst_245 = arith.constant 1.000000e+00 : f32
    %669 = vector.broadcast %cst_245 : f32 to vector<2x32xf32>
    %670 = arith.subf %669, %661 : vector<2x32xf32>
    %671 = arith.mulf %670, %668 : vector<2x32xf32>
    %672 = arith.mulf %661, %637 : vector<2x32xf32>
    %673 = arith.addf %671, %672 : vector<2x32xf32>
    %674 = arith.index_cast %c6_i32_239 : i32 to index
    %c0_246 = arith.constant 0 : index
    %c0_247 = arith.constant 0 : index
    %675 = vector.load %arg12[%674, %c0_246, %c0_247] : memref<8x2x32xf32, #tpu.memory_space<vmem>>, vector<1x2x32xf32>
    %676 = vector.shape_cast %675 : vector<1x2x32xf32> to vector<2x32xf32>
    %677 = vector.shape_cast %673 : vector<2x32xf32> to vector<1x2x32xf32>
    tpu.vector_store %arg12[%674, %c0_246, %c0_247], %677 {strides = array<i32>} : memref<8x2x32xf32, #tpu.memory_space<vmem>>, vector<1x2x32xf32>,
    %c7_i32_248 = arith.constant 7 : i32
    %678 = arith.index_cast %c7_i32_248 : i32 to index
    %c0_249 = arith.constant 0 : index
    %c0_250 = arith.constant 0 : index
    %679 = vector.load %arg13[%678, %c0_249, %c0_250] : memref<8x2x96xf32, #tpu.memory_space<vmem>>, vector<1x2x96xf32>
    %680 = vector.shape_cast %679 : vector<1x2x96xf32> to vector<2x96xf32>
    %cst_251 = arith.constant dense<0.000000e+00> : vector<2x96xf32>
    %681 = tpu.matmul %673, %423, %cst_251 {dimension_numbers = #tpu.dot_dimension_numbers<[1], [0], [0], [1], [0, 0, 1, 1], [], []>} : vector<2x32xf32>, vector<32x96xf32>, vector<2x96xf32> -> vector<2x96xf32>
    %682 = vector.extract_strided_slice %680 {offsets = [0, 0], sizes = [2, 32], strides = [1, 1]} : vector<2x96xf32> to vector<2x32xf32>
    %683 = vector.extract_strided_slice %681 {offsets = [0, 0], sizes = [2, 32], strides = [1, 1]} : vector<2x96xf32> to vector<2x32xf32>
    %684 = arith.addf %682, %683 : vector<2x32xf32>
    %685 = arith.negf %684 : vector<2x32xf32>
    %686 = math.exp %685 : vector<2x32xf32>
    %cst_252 = arith.constant 1.000000e+00 : f32
    %687 = vector.broadcast %cst_252 : f32 to vector<2x32xf32>
    %688 = arith.addf %687, %686 : vector<2x32xf32>
    %689 = arith.divf %687, %688 : vector<2x32xf32>
    %690 = vector.extract_strided_slice %680 {offsets = [0, 32], sizes = [2, 32], strides = [1, 1]} : vector<2x96xf32> to vector<2x32xf32>
    %691 = vector.extract_strided_slice %681 {offsets = [0, 32], sizes = [2, 32], strides = [1, 1]} : vector<2x96xf32> to vector<2x32xf32>
    %692 = arith.addf %690, %691 : vector<2x32xf32>
    %693 = arith.negf %692 : vector<2x32xf32>
    %694 = math.exp %693 : vector<2x32xf32>
    %cst_253 = arith.constant 1.000000e+00 : f32
    %695 = vector.broadcast %cst_253 : f32 to vector<2x32xf32>
    %696 = arith.addf %695, %694 : vector<2x32xf32>
    %697 = arith.divf %695, %696 : vector<2x32xf32>
    %698 = vector.extract_strided_slice %680 {offsets = [0, 64], sizes = [2, 32], strides = [1, 1]} : vector<2x96xf32> to vector<2x32xf32>
    %699 = vector.extract_strided_slice %681 {offsets = [0, 64], sizes = [2, 32], strides = [1, 1]} : vector<2x96xf32> to vector<2x32xf32>
    %700 = vector.broadcast %424 : vector<1x32xf32> to vector<2x32xf32>
    %701 = arith.addf %699, %700 : vector<2x32xf32>
    %702 = arith.mulf %689, %701 : vector<2x32xf32>
    %703 = arith.addf %698, %702 : vector<2x32xf32>
    %704 = math.tanh %703 : vector<2x32xf32>
    %cst_254 = arith.constant 1.000000e+00 : f32
    %705 = vector.broadcast %cst_254 : f32 to vector<2x32xf32>
    %706 = arith.subf %705, %697 : vector<2x32xf32>
    %707 = arith.mulf %706, %704 : vector<2x32xf32>
    %708 = arith.mulf %697, %673 : vector<2x32xf32>
    %709 = arith.addf %707, %708 : vector<2x32xf32>
    %710 = arith.index_cast %c7_i32_248 : i32 to index
    %c0_255 = arith.constant 0 : index
    %c0_256 = arith.constant 0 : index
    %711 = vector.load %arg12[%710, %c0_255, %c0_256] : memref<8x2x32xf32, #tpu.memory_space<vmem>>, vector<1x2x32xf32>
    %712 = vector.shape_cast %711 : vector<1x2x32xf32> to vector<2x32xf32>
    %713 = vector.shape_cast %709 : vector<2x32xf32> to vector<1x2x32xf32>
    tpu.vector_store %arg12[%710, %c0_255, %c0_256], %713 {strides = array<i32>} : memref<8x2x32xf32, #tpu.memory_space<vmem>>, vector<1x2x32xf32>,
    %c8_i32_257 = arith.constant 8 : i32
    %c0_258 = arith.constant 0 : index
    %c0_259 = arith.constant 0 : index
    %714 = vector.load %arg9[%c0_258, %c0_259] : memref<32x5xf32, #tpu.memory_space<vmem>>, vector<32x5xf32>
    %cst_260 = arith.constant dense<0.000000e+00> : vector<2x5xf32>
    %715 = tpu.matmul %709, %714, %cst_260 {dimension_numbers = #tpu.dot_dimension_numbers<[1], [0], [0], [1], [0, 0, 1, 1], [], []>} : vector<2x32xf32>, vector<32x5xf32>, vector<2x5xf32> -> vector<2x5xf32>
    %c0_261 = arith.constant 0 : index
    %c0_262 = arith.constant 0 : index
    %716 = vector.load %arg10[%c0_261, %c0_262] : memref<1x5xf32, #tpu.memory_space<vmem>>, vector<1x5xf32>
    %717 = vector.broadcast %716 : vector<1x5xf32> to vector<2x5xf32>
    %718 = arith.addf %715, %717 : vector<2x5xf32>
    %c0_263 = arith.constant 0 : index
    %c0_264 = arith.constant 0 : index
    %719 = vector.load %arg11[%c0_263, %c0_264] : memref<2x5xf32, #tpu.memory_space<vmem>>, vector<2x5xf32>
    tpu.vector_store %arg11[%c0_263, %c0_264], %718 {strides = array<i32>} : memref<2x5xf32, #tpu.memory_space<vmem>>, vector<2x5xf32>,
    return
  }
}

</mosaic_0001>

<bundles_post_ra>
// kernel: gru_forward.1
= control target key start
LH: loop header
LB: loop body
LE: loop exit
PB: predicated region body
PF: predicated region fallthrough
CT: control target
= control target key end

     0   :  { %16 = vsyncpa [#allocation5], 0  ;;  %s4621_s0 = inlined_call_operand.vmem [shape: f32[8,2,16], index: 0, kind: input, shape index: {}]   ;;  %s4622_s1 = inlined_call_operand.hbm [shape: f32[16,96], index: 1, kind: input, shape index: {}]   ;;  %s4623_s2 = inlined_call_operand.vmem [shape: f32[32,96], index: 2, kind: input, shape index: {}]   ;;  %s4624_s3 = inlined_call_operand.vmem [shape: f32[1,96], index: 3, kind: input, shape index: {}]   ;;  %s4625_s4 = inlined_call_operand.vmem [shape: f32[1,32], index: 4, kind: input, shape index: {}]   ;;  %s4626_s5 = inlined_call_operand.vmem [shape: f32[32,96], index: 5, kind: input, shape index: {}]   ;;  %s4627_s6 = inlined_call_operand.vmem [shape: f32[32,96], index: 6, kind: input, shape index: {}]   ;;  %s4628_s7 = inlined_call_operand.hbm [shape: f32[1,96], index: 7, kind: input, shape index: {}]   ;;  %s4629_s8 = inlined_call_operand.vmem [shape: f32[1,32], index: 8, kind: input, shape index: {}]   ;;  %s4630_s9 = inlined_call_operand.vmem [shape: f32[32,5], index: 9, kind: input, shape index: {}]   ;;  %s4631_s10 = inlined_call_operand.hbm [shape: f32[1,5], index: 10, kind: input, shape index: {}]   ;;  %s4632_s11 = inlined_call_operand.hbm [shape: f32[2,5], index: 11, kind: output, shape index: {}]  }
   0x1   :  { %17 = vsyncpa [#allocation8], 0 }
   0x2   :  { %18 = vsyncpa [#allocation6], 0  ;;  %s4041_s17 = smov [#allocation7]   ;;  %s4042_s19 = smov [#allocation4]  }
   0x3   :  { %s49_s18 = sshll.u32 %s4041_s17, 4  ;;  %s26_s20 = sshll.u32 %s4042_s19, 4  ;;  %s50_s18 = int_to_ptr.vmem [resolvable:$true] %s49_s18  ;;  %s4112_s20 = int_to_ptr.vmem [resolvable:$true] %s26_s20 }
   0x4   :  { %s3947_s23 = scalar_lea.hbm %s4628_s7, 16 }
   0x5   :  { %p3948_p0 = scmp.ne.s32.totalorder %s4628_s7, %s3947_s23  ;;  %p3951_p1 = scmp.lt.u32.totalorder %s3947_s23, %s4628_s7 }
   0x7   :  { %p3953_p2 = pnand %p3951_p1, %p3948_p0 }
   0x9   :  { %3956 = shalt.err (!%p3953_p2)
}
   0xa   :  { %s3957_s28 = scalar_lea.vmem %s50_s18, 16  ;;  %s3961_s29 = scalar_lea.vmem %s50_s18, 32 }
   0xb   :  { %p3958_p3 = scmp.ne.s32.totalorder %s50_s18, %s3957_s28  ;;  %p3962_p4 = scmp.lt.s32.totalorder %s50_s18, %s50_s18 }
   0xc   :  { %p3963_p5 = scmp.lt.s32.totalorder %s3961_s29, %s3957_s28 }
   0xe   :  { %p3964_p6 = por %p3963_p5, %p3962_p4 }
  0x10   :  { %p3965_p7 = pnand %p3964_p6, %p3958_p3 }
  0x12   :  { %3968 = shalt.err (!%p3965_p7)
}
  0x13   :  { %52 = dma.hbm_to_vmem [thread:$0]  %s4628_s7, 16, %s50_s18, [#allocation8]  }
  0x14   :  { %s3969_s15 = scalar_lea.hbm %s4622_s1, 256 }
  0x15   :  { %p3970_p8 = scmp.ne.s32.totalorder %s4622_s1, %s3969_s15  ;;  %p3973_p9 = scmp.lt.u32.totalorder %s3969_s15, %s4622_s1 }
  0x17   :  { %p3975_p10 = pnand %p3973_p9, %p3970_p8 }
  0x19   :  { %3978 = shalt.err (!%p3975_p10)
}
  0x1a   :  { %s3979_s22 = scalar_lea.vmem %s4112_s20, 256  ;;  %p3984_p12 = scmp.lt.s32.totalorder %s4112_s20, %s4112_s20 }
  0x1b   :  { %p3980_p11 = scmp.ne.s32.totalorder %s4112_s20, %s3979_s22  ;;  %p3985_p13 = scmp.lt.s32.totalorder %s3979_s22, %s3979_s22 }
  0x1d   :  { %p3986_p0 = por %p3985_p13, %p3984_p12 }
  0x1f   :  { %p3987_p1 = pnand %p3986_p0, %p3980_p11 }
  0x21   :  { %3990 = shalt.err (!%p3987_p1)
}
  0x22   :  { %s4043_s7 = smov 128   ;;  %s4044_s18 = smov 8  }
  0x23   :  { %32 = dma.hbm_to_vmem [thread:$0]  %s4622_s1, 256, %s4112_s20, [#allocation5], %s4043_s7, %s4043_s7, %s4044_s18  }
  0x24   :  { %s4045_s25 = smov [#allocation9]   ;;  %s3991_s29 = scalar_lea.hbm %s4631_s10, 16 }
  0x25   :  { %s63_s26 = sshll.u32 %s4045_s25, 4  ;;  %p3992_p2 = scmp.ne.s32.totalorder %s4631_s10, %s3991_s29  ;;  %s64_s26 = int_to_ptr.vmem [resolvable:$true] %s63_s26 }
  0x26   :  { %p3995_p3 = scmp.lt.u32.totalorder %s3991_s29, %s4631_s10 }
  0x28   :  { %p3997_p4 = pnand %p3995_p3, %p3992_p2 }
  0x2a   :  { %4000 = shalt.err (!%p3997_p4)
}
  0x2b   :  { %s4001_s15 = scalar_lea.vmem %s64_s26, 16  ;;  %s4005_s1 = scalar_lea.vmem %s64_s26, 32 }
  0x2c   :  { %p4002_p5 = scmp.ne.s32.totalorder %s64_s26, %s4001_s15  ;;  %p4006_p6 = scmp.lt.s32.totalorder %s64_s26, %s64_s26 }
  0x2d   :  { %p4007_p7 = scmp.lt.s32.totalorder %s4005_s1, %s4001_s15 }
  0x2f   :  { %p4008_p8 = por %p4007_p7, %p4006_p6 }
  0x31   :  { %p4009_p9 = pnand %p4008_p8, %p4002_p5 }
  0x33   :  { %4012 = shalt.err (!%p4009_p9)
}
  0x34   :  { %66 = dma.hbm_to_vmem [thread:$0]  %s4631_s10, 16, %s64_s26, [#allocation8]  }
  0x35   :  { %4035 = dma.done.wait [#allocation5], 256  }
  0x36   :  { %4036 = vsyncadd [#allocation5], 4294967040 }
  0x37   :  { %4037 = dma.done.wait [#allocation8], 32  }
  0x38   :  { %4038 = vsyncadd [#allocation8], 4294967264  ;;  %v4046_v0 = vmov 0.0|0.0   ;;  %vm4047_vm0 = vmmov 0   ;;  %v4048_v1 = vmov 0.0   ;;  %v76_v2 = vld [vmem:[#allocation4] sm:$0xff] }
  0x39   :  { %3672 = vmatprep.subr.bf16.mxu0 %v4046_v0  ;;  %3353 = vmatprep.mubr.msk.f32.mxu0 %vm4047_vm0, %v4048_v1  ;;  %v77_v3 = vld [vmem:[#allocation4 + $0x8] sm:$0xff]  ;;  %vm86_vm1 = vcmask 130048   ;;  %v3131_v5 = vld [vmem:[%s4621_s0 + $0x4] sm:$0x3]  ;;  %v79_v6 = vld [vmem:[%s4621_s0] sm:$0x3] }
  0x3a   :  { %3666 = vmatprep.subr.bf16.mxu1 %v4046_v0  ;;  %3339 = vmatprep.mubr.msk.f32.mxu1 %vm4047_vm0, %v4048_v1  ;;  %v4161_v4 = vpack.c.bf16 %v77_v3, %v76_v2  ;;  %v3144_v7 = vld [vmem:[%s4625_s4] ss:$0 sm:$0xff]  ;;  %s4049_s18 = smov 64   ;;  %v3135_v8 = vld [vmem:[%s4621_s0 + $0x8] sm:$0x3]  ;;  %v703_v13 = vld [vmem:[%s4623_s2 + $0x10] sm:$0xff] }
  0x3b   :  { %793 = vrot.lane.b32.xlu0 %v3144_v7, %s4049_s18  ;;  %v701_v9 = vld [vmem:[%s4623_s2] sm:$0xff]  ;;  %v702_v10 = vld [vmem:[%s4623_s2 + $0x8] sm:$0xff]  ;;  %v704_v14 = vld [vmem:[%s4623_s2 + $0x18] sm:$0xff]  ;;  %vm160_vm2 = vcmask 779264   ;;  %s4050_s19 = smov 96   ;;  %vm820_vm3 = vcmask 254976  }
  0x3c   :  { %3674 = vmatpush3.bf16.msra.mxu0 %v4161_v4  ;;  %3668 = vmatpush3.bf16.msra.mxu1 %v4161_v4  ;;  %v3139_v11 = vld [vmem:[%s4621_s0 + $0xc] sm:$0x3]  ;;  %v4203_v12 = vpack.c.bf16 %v702_v10, %v701_v9  ;;  %v4214_v15 = vpack.c.bf16 %v704_v14, %v703_v13  ;;  %v4231_v16 = vld [vmem:[%s4624_s3] ss:$0 sm:$0xff]  ;;  %v3129_v43 = vld [vmem:[%s4621_s0 + $0x2] sm:$0x3] }
  0x3d   :  { %3678 = vmatprep.subr.bf16.mxu0 %v4046_v0  ;;  %3669 = vmatprep.subr.bf16.mxu1 %v4046_v0  ;;  %v3133_v44 = vld [vmem:[%s4621_s0 + $0x6] sm:$0x3]  ;;  %v3137_v45 = vld [vmem:[%s4621_s0 + $0xa] sm:$0x3]  ;;  %v3141_v47 = vld [vmem:[%s4621_s0 + $0xe] sm:$0x3] }
  0x3e   :  { %vm707_vm4 = vcmask 261120   ;;  %vm3109_vm5 = vcmask 33792  }
  0x3f   :  { %3354 = vmatmul.mubr.msk.f32.vlgmr.msra.gmra.mrb[0].mxu0 %vm86_vm1, %v3131_v5  ;;  %3340 = vmatmul.mubr.msk.f32.vlgmr.msra.gmra.mrb[0].mxu1 %vm86_vm1, %v79_v6 }
  0x40   :  { %3680 = vmatpush3.bf16.msra.mxu0 %v4161_v4  ;;  %3367 = vmatprep.mubr.msk.f32.mxu0 %vm4047_vm0, %v4048_v1 }
  0x41   :  { %3684 = vmatprep.subr.bf16.mxu0 %v4046_v0  ;;  %3671 = vmatpush3.bf16.msra.mxu1 %v4161_v4 }
  0x42   :  { %3346 = vmatprep.mubr.msk.f32.mxu1 %vm4047_vm0, %v4048_v1  ;;  %3675 = vmatprep.subr.bf16.mxu1 %v4046_v0 }
  0x43   :  { %3368 = vmatmul.mubr.msk.f32.vlgmr.msra.gmra.mrb[2].mxu0 %vm86_vm1, %v3135_v8 }
  0x44   :  { %3686 = vmatpush3.bf16.msra.mxu0 %v4161_v4  ;;  %3381 = vmatprep.mubr.msk.f32.mxu0 %vm4047_vm0, %v4048_v1 }
  0x45   :  { %3690 = vmatprep.subr.bf16.mxu0 %v4046_v0  ;;  %3347 = vmatmul.mubr.msk.f32.vlgmr.msra.gmra.mrb[2].mxu1 %vm86_vm1, %v3129_v43 }
  0x46   :  { %3677 = vmatpush3.bf16.msra.mxu1 %v4161_v4  ;;  %3360 = vmatprep.mubr.msk.f32.mxu1 %vm4047_vm0, %v4048_v1 }
  0x47   :  { %3382 = vmatmul.mubr.msk.f32.vlgmr.msra.gmra.mrb[4].mxu0 %vm86_vm1, %v3139_v11  ;;  %3681 = vmatprep.subr.bf16.mxu1 %v4046_v0 }
  0x48   :  { %3692 = vmatpush3.bf16.msra.mxu0 %v4203_v12  ;;  %3399 = vmatprep.mubr.msk.f32.mxu0 %vm4047_vm0, %v4048_v1 }
  0x49   :  { %3693 = vmatprep.subr.bf16.mxu0 %v4046_v0  ;;  %3361 = vmatmul.mubr.msk.f32.vlgmr.msra.gmra.mrb[4].mxu1 %vm86_vm1, %v3133_v44 }
  0x4a   :  { %3683 = vmatpush3.bf16.msra.mxu1 %v4161_v4  ;;  %3374 = vmatprep.mubr.msk.f32.mxu1 %vm4047_vm0, %v4048_v1 }
  0x4b   :  { %3687 = vmatprep.subr.bf16.mxu1 %v4046_v0 }
  0x4c   :  { %3695 = vmatpush3.bf16.msra.mxu0 %v4214_v15 }
  0x4d   :  { %3702 = vmatprep.subr.bf16.mxu0 %v4046_v0  ;;  %3375 = vmatmul.mubr.msk.f32.vlgmr.msra.gmra.mrb[6].mxu1 %vm86_vm1, %v3137_v45 }
  0x4e   :  { %3689 = vmatpush3.bf16.msra.mxu1 %v4161_v4  ;;  %3388 = vmatprep.mubr.msk.f32.mxu1 %vm4047_vm0, %v4048_v1 }
  0x4f   :  { %3400 = vmatmul.mubr.f32.vlgmr.msra.gmra.mrb[6].mxu0 %v4048_v1  ;;  %3696 = vmatprep.subr.bf16.mxu1 %v4046_v0 }
  0x50   :  { %3704 = vmatpush3.bf16.msra.mxu0 %v4203_v12  ;;  %3421 = vmatprep.mubr.msk.f32.mxu0 %vm4047_vm0, %v4048_v1 }
  0x51   :  { %3705 = vmatprep.subr.bf16.mxu0 %v4046_v0  ;;  %3389 = vmatmul.mubr.msk.f32.vlgmr.msra.gmra.mrb[8].mxu1 %vm86_vm1, %v3141_v47 }
  0x52   :  { %3698 = vmatpush3.bf16.msra.mxu1 %v4203_v12  ;;  %3410 = vmatprep.mubr.msk.f32.mxu1 %vm4047_vm0, %v4048_v1 }
  0x53   :  { %3699 = vmatprep.subr.bf16.mxu1 %v4046_v0 }
  0x54   :  { %3707 = vmatpush3.bf16.msra.mxu0 %v4214_v15 }
  0x55   :  { %3714 = vmatprep.subr.bf16.mxu0 %v4046_v0 }
  0x56   :  { %3701 = vmatpush3.bf16.msra.mxu1 %v4214_v15 }
  0x57   :  { %3708 = vmatprep.subr.bf16.mxu1 %v4046_v0 }
  0xad   :  { %v4241_v29 = vpop.permute.xlu0 %793 }
 0x112   :  { %v310_v17 = vpop.f32.mrb[0].mxu0  ;;  %v156_v18 = vpop.f32.mrb[0].mxu1 }
 0x113   :  { %v311_v19 = vadd.f32 %v4231_v16, %v310_v17  ;;  %v3355_v20 = vpop.f32.mrb[1].mxu0  ;;  %v157_v21 = vadd.f32 %v4231_v16, %v156_v18  ;;  %v3341_v22 = vpop.f32.mrb[1].mxu1 }
 0x115   :  { %315 = vst.msk [vmem:[#allocation3 + $0x4] sm:$0x3] %vm160_vm2, %v311_v19  ;;  %161 = vst.msk [vmem:[#allocation3] sm:$0x3] %vm160_vm2, %v157_v21 }
 0x116   :  { %v464_v23 = vpop.f32.mrb[2].mxu0 }
 0x117   :  { %v465_v24 = vadd.f32 %v4231_v16, %v464_v23  ;;  %v3369_v25 = vpop.f32.mrb[3].mxu0 }
 0x118   :  { %v233_v53 = vpop.f32.mrb[2].mxu1 }
 0x119   :  { %469 = vst.msk [vmem:[#allocation3 + $0x8] sm:$0x3] %vm160_vm2, %v465_v24  ;;  %v234_v54 = vadd.f32 %v4231_v16, %v233_v53  ;;  %v3348_v55 = vpop.f32.mrb[3].mxu1 }
 0x11a   :  { %v618_v26 = vpop.f32.mrb[4].mxu0 }
 0x11b   :  { %v619_v27 = vadd.f32 %v4231_v16, %v618_v26  ;;  %v3383_v28 = vpop.f32.mrb[5].mxu0  ;;  %238 = vst.msk [vmem:[#allocation3 + $0x2] sm:$0x3] %vm160_vm2, %v234_v54 }
 0x11c   :  { %v706_v33 = vld [vmem:[#allocation3] sm:$0x3]  ;;  %v387_v56 = vpop.f32.mrb[4].mxu1 }
 0x11d   :  { %623 = vst.msk [vmem:[#allocation3 + $0xc] sm:$0x3] %vm160_vm2, %v619_v27  ;;  %v388_v57 = vadd.f32 %v4231_v16, %v387_v56  ;;  %v3362_v58 = vpop.f32.mrb[5].mxu1 }
 0x11f   :  { %392 = vst.msk [vmem:[#allocation3 + $0x6] sm:$0x3] %vm160_vm2, %v388_v57 }
 0x120   :  { %v541_v59 = vpop.f32.mrb[6].mxu1 }
 0x121   :  { %v542_v60 = vadd.f32 %v4231_v16, %v541_v59  ;;  %v3376_v61 = vpop.f32.mrb[7].mxu1 }
 0x122   :  { %v777_v30 = vpop.f32.mrb[6].mxu0  ;;  %v822_v7 = vld [vmem:[#allocation3 + $0x2] sm:$0x3] }
 0x123   :  { %v796_v31 = vadd.f32 %v4241_v29, %v777_v30  ;;  %v3401_v32 = vpop.f32.mrb[7].mxu0  ;;  %v781_v34 = vadd.f32 %v777_v30, %v706_v33  ;;  %546 = vst.msk [vmem:[#allocation3 + $0xa] sm:$0x3] %vm160_vm2, %v542_v60  ;;  %v928_v30 = vld [vmem:[#allocation3 + $0x4] sm:$0x3] }
 0x124   :  { %v695_v62 = vpop.f32.mrb[8].mxu1 }
 0x125   :  { %798 = vrot.lane.b32.xlu0 %v796_v31, %s4049_s18  ;;  %v3143_v35 = vmul.f32 -1.442695, %v781_v34  ;;  %v696_v63 = vadd.f32 %v4231_v16, %v695_v62  ;;  %v3390_v2 = vpop.f32.mrb[9].mxu1 }
 0x127   :  { %3851 = vpow2.f32 %v3143_v35  ;;  %700 = vst.msk [vmem:[#allocation3 + $0xe] sm:$0x3] %vm160_vm2, %v696_v63 }
 0x131   :  { %v3852_v36 = vpop.eup %3851 }
 0x132   :  { %v785_v37 = vadd.f32 1.0, %v3852_v36 }
 0x134   :  { %3853 = vrcp.f32 %v785_v37 }
 0x13e   :  { %v3854_v38 = vpop.eup %3853 }
 0x13f   :  { %v808_v48 = vsub.f32 1.0, %v3854_v38  ;;  %v814_v50 = vmul.f32 0.0, %v3854_v38 }
 0x197   :  { %v799_v39 = vpop.permute.xlu0 %798 }
 0x198   :  { %v801_v40 = vmul.f32 %v3854_v38, %v799_v39 }
 0x19a   :  { %803 = vrot.lane.b32.xlu1 %v801_v40, %s4049_s18 }
 0x20c   :  { %v804_v41 = vpop.permute.xlu1 %803 }
 0x20d   :  { %v806_v42 = vadd.f32 %v804_v41, %v706_v33 }
 0x20f   :  { %3855 = vtanh.f32 %v806_v42 }
 0x219   :  { %v3856_v46 = vpop.eup %3855 }
 0x21a   :  { %810 = vrot.lane.b32.xlu1 %v3856_v46, %s4050_s19 }
 0x28c   :  { %v811_v49 = vpop.permute.xlu1 %810 }
 0x28d   :  { %v813_v51 = vmul.f32 %v811_v49, %v808_v48 }
 0x28f   :  { %v815_v52 = vadd.f32 %v814_v50, %v813_v51  ;;  %v1034_v50 = vld [vmem:[#allocation3 + $0x6] sm:$0x3] }
 0x291   :  { %817 = vrot.lane.b32.xlu0 %v815_v52, %s4050_s19 }
 0x303   :  { %v818_v3 = vpop.permute.xlu0 %817 }
 0x304   :  { %821 = vst.msk [vmem:[#allocation2] sm:$0x3] %vm820_vm3, %v818_v3  ;;  %3411 = vmatmul.mubr.msk.f32.vlgmr.msra.gmra.mrb[10].mxu1 %vm707_vm4, %v818_v3 }
 0x305   :  { %3710 = vmatpush3.bf16.msra.mxu1 %v4203_v12  ;;  %3432 = vmatprep.mubr.msk.f32.mxu1 %vm4047_vm0, %v4048_v1 }
 0x306   :  { %3711 = vmatprep.subr.bf16.mxu1 %v4046_v0 }
 0x309   :  { %3713 = vmatpush3.bf16.msra.mxu1 %v4214_v15 }
 0x30a   :  { %3720 = vmatprep.subr.bf16.mxu1 %v4046_v0 }
 0x3d7   :  { %v891_v4 = vpop.f32.mrb[10].mxu1 }
 0x3d8   :  { %v902_v5 = vadd.f32 %v891_v4, %v4241_v29  ;;  %v3412_v6 = vpop.f32.mrb[11].mxu1  ;;  %v895_v8 = vadd.f32 %v891_v4, %v822_v7 }
 0x3da   :  { %904 = vrot.lane.b32.xlu1 %v902_v5, %s4049_s18  ;;  %v3146_v9 = vmul.f32 -1.442695, %v895_v8  ;;  %v1140_v8 = vld [vmem:[#allocation3 + $0x8] sm:$0x3] }
 0x3dc   :  { %3857 = vpow2.f32 %v3146_v9 }
 0x3e6   :  { %v3858_v10 = vpop.eup %3857 }
 0x3e7   :  { %v899_v11 = vadd.f32 1.0, %v3858_v10 }
 0x3e9   :  { %3859 = vrcp.f32 %v899_v11 }
 0x3f3   :  { %v3860_v13 = vpop.eup %3859 }
 0x3f4   :  { %v914_v20 = vsub.f32 1.0, %v3860_v13  ;;  %v920_v22 = vmul.f32 %v3860_v13, %v815_v52 }
 0x44c   :  { %v905_v14 = vpop.permute.xlu1 %904 }
 0x44d   :  { %v907_v16 = vmul.f32 %v3860_v13, %v905_v14 }
 0x44f   :  { %909 = vrot.lane.b32.xlu0 %v907_v16, %s4049_s18 }
 0x4c1   :  { %v910_v17 = vpop.permute.xlu0 %909 }
 0x4c2   :  { %v912_v18 = vadd.f32 %v910_v17, %v822_v7 }
 0x4c4   :  { %3861 = vtanh.f32 %v912_v18 }
 0x4ce   :  { %v3862_v19 = vpop.eup %3861 }
 0x4cf   :  { %916 = vrot.lane.b32.xlu1 %v3862_v19, %s4050_s19 }
 0x541   :  { %v917_v21 = vpop.permute.xlu1 %916 }
 0x542   :  { %v919_v23 = vmul.f32 %v917_v21, %v914_v20 }
 0x544   :  { %v921_v24 = vadd.f32 %v920_v22, %v919_v23 }
 0x546   :  { %923 = vrot.lane.b32.xlu0 %v921_v24, %s4050_s19 }
 0x5b8   :  { %v924_v25 = vpop.permute.xlu0 %923 }
 0x5b9   :  { %927 = vst.msk [vmem:[#allocation2 + $0x2] sm:$0x3] %vm820_vm3, %v924_v25  ;;  %3422 = vmatmul.mubr.msk.f32.vlgmr.msra.gmra.mrb[8].mxu0 %vm707_vm4, %v924_v25 }
 0x5ba   :  { %3716 = vmatpush3.bf16.msra.mxu0 %v4203_v12  ;;  %3443 = vmatprep.mubr.msk.f32.mxu0 %vm4047_vm0, %v4048_v1 }
 0x5bb   :  { %3717 = vmatprep.subr.bf16.mxu0 %v4046_v0 }
 0x5be   :  { %3719 = vmatpush3.bf16.msra.mxu0 %v4214_v15 }
 0x5bf   :  { %3726 = vmatprep.subr.bf16.mxu0 %v4046_v0 }
 0x68c   :  { %v997_v26 = vpop.f32.mrb[8].mxu0 }
 0x68d   :  { %v1008_v27 = vadd.f32 %v997_v26, %v4241_v29  ;;  %v3423_v28 = vpop.f32.mrb[9].mxu0  ;;  %v1001_v31 = vadd.f32 %v997_v26, %v928_v30 }
 0x68f   :  { %1010 = vrot.lane.b32.xlu1 %v1008_v27, %s4049_s18  ;;  %v3148_v32 = vmul.f32 -1.442695, %v1001_v31  ;;  %v1246_v31 = vld [vmem:[#allocation3 + $0xa] sm:$0x3] }
 0x691   :  { %3863 = vpow2.f32 %v3148_v32 }
 0x69b   :  { %v3864_v33 = vpop.eup %3863 }
 0x69c   :  { %v1005_v34 = vadd.f32 1.0, %v3864_v33 }
 0x69e   :  { %3865 = vrcp.f32 %v1005_v34 }
 0x6a8   :  { %v3866_v35 = vpop.eup %3865 }
 0x6a9   :  { %v1020_v41 = vsub.f32 1.0, %v3866_v35  ;;  %v1026_v43 = vmul.f32 %v3866_v35, %v921_v24 }
 0x701   :  { %v1011_v36 = vpop.permute.xlu1 %1010 }
 0x702   :  { %v1013_v37 = vmul.f32 %v3866_v35, %v1011_v36 }
 0x704   :  { %1015 = vrot.lane.b32.xlu0 %v1013_v37, %s4049_s18 }
 0x776   :  { %v1016_v38 = vpop.permute.xlu0 %1015 }
 0x777   :  { %v1018_v39 = vadd.f32 %v1016_v38, %v928_v30 }
 0x779   :  { %3867 = vtanh.f32 %v1018_v39 }
 0x783   :  { %v3868_v40 = vpop.eup %3867 }
 0x784   :  { %1022 = vrot.lane.b32.xlu1 %v3868_v40, %s4050_s19 }
 0x7f6   :  { %v1023_v42 = vpop.permute.xlu1 %1022 }
 0x7f7   :  { %v1025_v44 = vmul.f32 %v1023_v42, %v1020_v41 }
 0x7f9   :  { %v1027_v45 = vadd.f32 %v1026_v43, %v1025_v44 }
 0x7fb   :  { %1029 = vrot.lane.b32.xlu0 %v1027_v45, %s4050_s19 }
 0x86d   :  { %v1030_v46 = vpop.permute.xlu0 %1029 }
 0x86e   :  { %1033 = vst.msk [vmem:[#allocation2 + $0x4] sm:$0x3] %vm820_vm3, %v1030_v46  ;;  %3433 = vmatmul.mubr.msk.f32.vlgmr.msra.gmra.mrb[12].mxu1 %vm707_vm4, %v1030_v46  ;;  %v1565_v46 = vld [vmem:[%s4626_s5 + $0x8] sm:$0xff] }
 0x86f   :  { %3722 = vmatpush3.bf16.msra.mxu1 %v4203_v12  ;;  %3454 = vmatprep.mubr.msk.f32.mxu1 %vm4047_vm0, %v4048_v1 }
 0x870   :  { %3723 = vmatprep.subr.bf16.mxu1 %v4046_v0 }
 0x873   :  { %3725 = vmatpush3.bf16.msra.mxu1 %v4214_v15 }
 0x874   :  { %3732 = vmatprep.subr.bf16.mxu1 %v4046_v0 }
 0x941   :  { %v1103_v47 = vpop.f32.mrb[12].mxu1 }
 0x942   :  { %v1114_v48 = vadd.f32 %v1103_v47, %v4241_v29  ;;  %v3434_v49 = vpop.f32.mrb[13].mxu1  ;;  %v1107_v51 = vadd.f32 %v1103_v47, %v1034_v50 }
 0x943   :  { %v1567_v49 = vld [vmem:[%s4626_s5 + $0x18] sm:$0xff] }
 0x944   :  { %1116 = vrot.lane.b32.xlu1 %v1114_v48, %s4049_s18  ;;  %v3150_v52 = vmul.f32 -1.442695, %v1107_v51  ;;  %v1566_v48 = vld [vmem:[%s4626_s5 + $0x10] sm:$0xff] }
 0x945   :  { %v4375_v51 = vpack.c.bf16 %v1567_v49, %v1566_v48 }
 0x946   :  { %3869 = vpow2.f32 %v3150_v52  ;;  %v1569_v52 = vld [vmem:[#allocation2] sm:$0x3] }
 0x950   :  { %v3870_v53 = vpop.eup %3869 }
 0x951   :  { %v1111_v54 = vadd.f32 1.0, %v3870_v53  ;;  %v1725_v53 = vld [vmem:[#allocation2 + $0x4] sm:$0x3] }
 0x953   :  { %3871 = vrcp.f32 %v1111_v54 }
 0x95d   :  { %v3872_v55 = vpop.eup %3871 }
 0x95e   :  { %v1126_v61 = vsub.f32 1.0, %v3872_v55  ;;  %v1132_v63 = vmul.f32 %v3872_v55, %v1027_v45  ;;  %v1564_v45 = vld [vmem:[%s4626_s5] sm:$0xff] }
 0x95f   :  { %v4364_v47 = vpack.c.bf16 %v1565_v46, %v1564_v45 }
 0x9b6   :  { %v1117_v56 = vpop.permute.xlu1 %1116 }
 0x9b7   :  { %v1119_v57 = vmul.f32 %v3872_v55, %v1117_v56 }
 0x9b9   :  { %1121 = vrot.lane.b32.xlu0 %v1119_v57, %s4049_s18 }
 0xa2b   :  { %v1122_v58 = vpop.permute.xlu0 %1121 }
 0xa2c   :  { %v1124_v59 = vadd.f32 %v1122_v58, %v1034_v50  ;;  %v4405_v58 = vld [vmem:[#allocation7] ss:$0 sm:$0xff] }
 0xa2e   :  { %3873 = vtanh.f32 %v1124_v59 }
 0xa38   :  { %v3874_v60 = vpop.eup %3873 }
 0xa39   :  { %1128 = vrot.lane.b32.xlu1 %v3874_v60, %s4050_s19 }
 0xaab   :  { %v1129_v62 = vpop.permute.xlu1 %1128 }
 0xaac   :  { %v1131_v2 = vmul.f32 %v1129_v62, %v1126_v61 }
 0xaae   :  { %v1133_v3 = vadd.f32 %v1132_v63, %v1131_v2 }
 0xab0   :  { %1135 = vrot.lane.b32.xlu0 %v1133_v3, %s4050_s19 }
 0xb22   :  { %v1136_v4 = vpop.permute.xlu0 %1135 }
 0xb23   :  { %1139 = vst.msk [vmem:[#allocation2 + $0x6] sm:$0x3] %vm820_vm3, %v1136_v4  ;;  %3444 = vmatmul.mubr.msk.f32.vlgmr.msra.gmra.mrb[10].mxu0 %vm707_vm4, %v1136_v4 }
 0xb24   :  { %3728 = vmatpush3.bf16.msra.mxu0 %v4203_v12  ;;  %3465 = vmatprep.mubr.msk.f32.mxu0 %vm4047_vm0, %v4048_v1 }
 0xb25   :  { %3729 = vmatprep.subr.bf16.mxu0 %v4046_v0 }
 0xb28   :  { %3731 = vmatpush3.bf16.msra.mxu0 %v4214_v15 }
 0xb29   :  { %3738 = vmatprep.subr.bf16.mxu0 %v4046_v0 }
 0xbf6   :  { %v1209_v5 = vpop.f32.mrb[10].mxu0 }
 0xbf7   :  { %v1220_v6 = vadd.f32 %v1209_v5, %v4241_v29  ;;  %v3445_v7 = vpop.f32.mrb[11].mxu0  ;;  %v1213_v9 = vadd.f32 %v1209_v5, %v1140_v8 }
 0xbf9   :  { %1222 = vrot.lane.b32.xlu1 %v1220_v6, %s4049_s18  ;;  %v3152_v10 = vmul.f32 -1.442695, %v1213_v9  ;;  %v1352_v6 = vld [vmem:[#allocation3 + $0xc] sm:$0x3] }
 0xbfb   :  { %3875 = vpow2.f32 %v3152_v10 }
 0xc05   :  { %v3876_v11 = vpop.eup %3875 }
 0xc06   :  { %v1217_v13 = vadd.f32 1.0, %v3876_v11 }
 0xc08   :  { %3877 = vrcp.f32 %v1217_v13 }
 0xc12   :  { %v3878_v14 = vpop.eup %3877 }
 0xc13   :  { %v1232_v21 = vsub.f32 1.0, %v3878_v14  ;;  %v1238_v23 = vmul.f32 %v3878_v14, %v1133_v3 }
 0xc6b   :  { %v1223_v16 = vpop.permute.xlu1 %1222 }
 0xc6c   :  { %v1225_v17 = vmul.f32 %v3878_v14, %v1223_v16 }
 0xc6e   :  { %1227 = vrot.lane.b32.xlu0 %v1225_v17, %s4049_s18 }
 0xce0   :  { %v1228_v18 = vpop.permute.xlu0 %1227 }
 0xce1   :  { %v1230_v19 = vadd.f32 %v1228_v18, %v1140_v8 }
 0xce3   :  { %3879 = vtanh.f32 %v1230_v19 }
 0xced   :  { %v3880_v20 = vpop.eup %3879 }
 0xcee   :  { %1234 = vrot.lane.b32.xlu1 %v3880_v20, %s4050_s19 }
 0xd60   :  { %v1235_v22 = vpop.permute.xlu1 %1234 }
 0xd61   :  { %v1237_v24 = vmul.f32 %v1235_v22, %v1232_v21 }
 0xd63   :  { %v1239_v25 = vadd.f32 %v1238_v23, %v1237_v24  ;;  %v3169_v24 = vld [vmem:[%s4629_s8] ss:$0 sm:$0xff] }
 0xd65   :  { %1241 = vrot.lane.b32.xlu0 %v1239_v25, %s4050_s19 }
 0xdd7   :  { %v1242_v26 = vpop.permute.xlu0 %1241 }
 0xdd8   :  { %1245 = vst.msk [vmem:[#allocation2 + $0x8] sm:$0x3] %vm820_vm3, %v1242_v26  ;;  %3455 = vmatmul.mubr.msk.f32.vlgmr.msra.gmra.mrb[14].mxu1 %vm707_vm4, %v1242_v26  ;;  %v2175_v26 = vld [vmem:[%s4627_s6] sm:$0xff] }
 0xdd9   :  { %3734 = vmatpush3.bf16.msra.mxu1 %v4203_v12  ;;  %3476 = vmatprep.mubr.msk.f32.mxu1 %vm4047_vm0, %v4048_v1 }
 0xdda   :  { %3735 = vmatprep.subr.bf16.mxu1 %v4046_v0 }
 0xddd   :  { %3737 = vmatpush3.bf16.msra.mxu1 %v4214_v15 }
 0xdde   :  { %3744 = vmatprep.subr.bf16.mxu1 %v4046_v0 }
 0xddf   :  { %v1875_v54 = vld [vmem:[#allocation2 + $0x8] sm:$0x3] }
 0xeab   :  { %v1315_v27 = vpop.f32.mrb[14].mxu1 }
 0xeac   :  { %v1326_v28 = vadd.f32 %v1315_v27, %v4241_v29  ;;  %v3456_v30 = vpop.f32.mrb[15].mxu1  ;;  %v1319_v32 = vadd.f32 %v1315_v27, %v1246_v31  ;;  %v2176_v27 = vld [vmem:[%s4627_s6 + $0x8] sm:$0xff] }
 0xead   :  { %v2177_v30 = vld [vmem:[%s4627_s6 + $0x10] sm:$0xff] }
 0xeae   :  { %1328 = vrot.lane.b32.xlu1 %v1326_v28, %s4049_s18  ;;  %v3154_v33 = vmul.f32 -1.442695, %v1319_v32  ;;  %v4437_v28 = vpack.c.bf16 %v2176_v27, %v2175_v26  ;;  %v1650_v32 = vld [vmem:[#allocation2 + $0x2] sm:$0x3] }
 0xeb0   :  { %3881 = vpow2.f32 %v3154_v33 }
 0xeba   :  { %v3882_v12 = vpop.eup %3881 }
 0xebb   :  { %v1323_v34 = vadd.f32 1.0, %v3882_v12 }
 0xebd   :  { %3883 = vrcp.f32 %v1323_v34  ;;  %v1800_v34 = vld [vmem:[#allocation2 + $0x6] sm:$0x3] }
 0xec7   :  { %v3884_v35 = vpop.eup %3883 }
 0xec8   :  { %v1338_v40 = vsub.f32 1.0, %v3884_v35  ;;  %v1344_v42 = vmul.f32 %v3884_v35, %v1239_v25 }
 0xf20   :  { %v1329_v36 = vpop.permute.xlu1 %1328 }
 0xf21   :  { %v1331_v37 = vmul.f32 %v3884_v35, %v1329_v36 }
 0xf23   :  { %1333 = vrot.lane.b32.xlu0 %v1331_v37, %s4049_s18 }
 0xf95   :  { %v1334_v15 = vpop.permute.xlu0 %1333 }
 0xf96   :  { %v1336_v38 = vadd.f32 %v1334_v15, %v1246_v31  ;;  %v2178_v31 = vld [vmem:[%s4627_s6 + $0x18] sm:$0xff] }
 0xf97   :  { %v4450_v12 = vpack.c.bf16 %v2178_v31, %v2177_v30 }
 0xf98   :  { %3885 = vtanh.f32 %v1336_v38 }
 0xfa2   :  { %v3886_v39 = vpop.eup %3885 }
 0xfa3   :  { %1340 = vrot.lane.b32.xlu1 %v3886_v39, %s4050_s19 }
0x1015   :  { %v1341_v41 = vpop.permute.xlu1 %1340 }
0x1016   :  { %v1343_v43 = vmul.f32 %v1341_v41, %v1338_v40 }
0x1018   :  { %v4354_v44 = vadd.f32 %v1344_v42, %v1343_v43 }
0x101a   :  { %1347 = vrot.lane.b32.xlu0 %v4354_v44, %s4050_s19 }
0x108c   :  { %v1348_v50 = vpop.permute.xlu0 %1347 }
0x108d   :  { %1351 = vst.msk [vmem:[#allocation2 + $0xa] sm:$0x3] %vm820_vm3, %v1348_v50  ;;  %3466 = vmatmul.mubr.msk.f32.vlgmr.msra.gmra.mrb[12].mxu0 %vm707_vm4, %v1348_v50 }
0x108e   :  { %3740 = vmatpush3.bf16.msra.mxu0 %v4364_v47  ;;  %3487 = vmatprep.mubr.msk.f32.mxu0 %vm4047_vm0, %v4048_v1 }
0x108f   :  { %3741 = vmatprep.subr.bf16.mxu0 %v4046_v0 }
0x1092   :  { %3743 = vmatpush3.bf16.msra.mxu0 %v4375_v51 }
0x1093   :  { %3750 = vmatprep.subr.bf16.mxu0 %v4046_v0 }
0x1094   :  { %v1950_v35 = vld [vmem:[#allocation2 + $0xa] sm:$0x3] }
0x1095   :  { %3488 = vmatmul.mubr.msk.f32.vlgmr.msra.gmra.mrb[14].mxu0 %vm707_vm4, %v1569_v52 }
0x1096   :  { %3752 = vmatpush3.bf16.msra.mxu0 %v4364_v47  ;;  %3509 = vmatprep.mubr.msk.f32.mxu0 %vm4047_vm0, %v4048_v1 }
0x1097   :  { %3753 = vmatprep.subr.bf16.mxu0 %v4046_v0 }
0x109a   :  { %3755 = vmatpush3.bf16.msra.mxu0 %v4375_v51 }
0x109b   :  { %3762 = vmatprep.subr.bf16.mxu0 %v4046_v0 }
0x109d   :  { %3510 = vmatmul.mubr.msk.f32.vlgmr.msra.gmra.mrb[16].mxu0 %vm707_vm4, %v1725_v53  ;;  %v1458_v53 = vld [vmem:[#allocation3 + $0xe] sm:$0x3] }
0x109e   :  { %3764 = vmatpush3.bf16.msra.mxu0 %v4364_v47  ;;  %3531 = vmatprep.mubr.msk.f32.mxu0 %vm4047_vm0, %v4048_v1 }
0x109f   :  { %3765 = vmatprep.subr.bf16.mxu0 %v4046_v0 }
0x10a2   :  { %3767 = vmatpush3.bf16.msra.mxu0 %v4375_v51 }
0x10a3   :  { %3774 = vmatprep.subr.bf16.mxu0 %v4046_v0 }
0x10a5   :  { %3532 = vmatmul.mubr.msk.f32.vlgmr.msra.gmra.mrb[18].mxu0 %vm707_vm4, %v1875_v54 }
0x10a6   :  { %3776 = vmatpush3.bf16.msra.mxu0 %v4364_v47  ;;  %3553 = vmatprep.mubr.msk.f32.mxu0 %vm4047_vm0, %v4048_v1 }
0x10a7   :  { %3777 = vmatprep.subr.bf16.mxu0 %v4046_v0 }
0x10aa   :  { %3779 = vmatpush3.bf16.msra.mxu0 %v4375_v51 }
0x10ab   :  { %3786 = vmatprep.subr.bf16.mxu0 %v4046_v0 }
0x1160   :  { %v1421_v55 = vpop.f32.mrb[12].mxu0 }
0x1161   :  { %v1432_v56 = vadd.f32 %v1421_v55, %v4241_v29  ;;  %v3467_v57 = vpop.f32.mrb[13].mxu0  ;;  %v1425_v7 = vadd.f32 %v1421_v55, %v1352_v6 }
0x1163   :  { %1434 = vrot.lane.b32.xlu1 %v1432_v56, %s4049_s18  ;;  %v3156_v8 = vmul.f32 -1.442695, %v1425_v7 }
0x1165   :  { %3887 = vpow2.f32 %v3156_v8 }
0x1168   :  { %v1645_v59 = vpop.f32.mrb[14].mxu0 }
0x1169   :  { %v1646_v60 = vadd.f32 %v4405_v58, %v1645_v59  ;;  %v3489_v61 = vpop.f32.mrb[15].mxu0 }
0x116b   :  { %1649 = vst.msk [vmem:[#allocation3] sm:$0x3] %vm160_vm2, %v1646_v60 }
0x116f   :  { %v3888_v9 = vpop.eup %3887 }
0x1170   :  { %v1795_v62 = vpop.f32.mrb[16].mxu0  ;;  %v1429_v10 = vadd.f32 1.0, %v3888_v9 }
0x1171   :  { %v1796_v63 = vadd.f32 %v4405_v58, %v1795_v62  ;;  %v3511_v2 = vpop.f32.mrb[17].mxu0 }
0x1172   :  { %3889 = vrcp.f32 %v1429_v10  ;;  %v2180_v56 = vld [vmem:[#allocation3] sm:$0x3] }
0x1173   :  { %1799 = vst.msk [vmem:[#allocation3 + $0x4] sm:$0x3] %vm160_vm2, %v1796_v63 }
0x1178   :  { %v1945_v3 = vpop.f32.mrb[18].mxu0 }
0x1179   :  { %v1946_v4 = vadd.f32 %v4405_v58, %v1945_v3  ;;  %v3533_v5 = vpop.f32.mrb[19].mxu0 }
0x117b   :  { %1949 = vst.msk [vmem:[#allocation3 + $0x8] sm:$0x3] %vm160_vm2, %v1946_v4 }
0x117c   :  { %v3890_v11 = vpop.eup %3889 }
0x117d   :  { %v1444_v19 = vsub.f32 1.0, %v3890_v11  ;;  %v1450_v21 = vmul.f32 %v3890_v11, %v4354_v44 }
0x11d5   :  { %v1435_v13 = vpop.permute.xlu1 %1434 }
0x11d6   :  { %v1437_v14 = vmul.f32 %v3890_v11, %v1435_v13 }
0x11d8   :  { %1439 = vrot.lane.b32.xlu0 %v1437_v14, %s4049_s18 }
0x124a   :  { %v1440_v16 = vpop.permute.xlu0 %1439 }
0x124b   :  { %v1442_v17 = vadd.f32 %v1440_v16, %v1352_v6 }
0x124d   :  { %3891 = vtanh.f32 %v1442_v17 }
0x1257   :  { %v3892_v18 = vpop.eup %3891 }
0x1258   :  { %1446 = vrot.lane.b32.xlu1 %v3892_v18, %s4050_s19 }
0x125c   :  { %2263 = vrot.lane.b32.xlu1 %v3169_v24, %s4049_s18 }
0x12ca   :  { %v1447_v20 = vpop.permute.xlu1 %1446 }
0x12cb   :  { %v1449_v22 = vmul.f32 %v1447_v20, %v1444_v19 }
0x12cd   :  { %v4416_v23 = vadd.f32 %v1450_v21, %v1449_v22 }
0x12ce   :  { %v4489_v44 = vpop.permute.xlu1 %2263 }
0x12cf   :  { %1453 = vrot.lane.b32.xlu0 %v4416_v23, %s4050_s19 }
0x1341   :  { %v1454_v25 = vpop.permute.xlu0 %1453 }
0x1342   :  { %1457 = vst.msk [vmem:[#allocation2 + $0xc] sm:$0x3] %vm820_vm3, %v1454_v25  ;;  %3477 = vmatmul.mubr.msk.f32.vlgmr.msra.gmra.mrb[16].mxu1 %vm707_vm4, %v1454_v25 }
0x1343   :  { %3746 = vmatpush3.bf16.msra.mxu1 %v4364_v47  ;;  %3498 = vmatprep.mubr.msk.f32.mxu1 %vm4047_vm0, %v4048_v1 }
0x1344   :  { %3747 = vmatprep.subr.bf16.mxu1 %v4046_v0 }
0x1347   :  { %3749 = vmatpush3.bf16.msra.mxu1 %v4375_v51 }
0x1348   :  { %3756 = vmatprep.subr.bf16.mxu1 %v4046_v0 }
0x1349   :  { %v2025_v33 = vld [vmem:[#allocation2 + $0xc] sm:$0x3] }
0x134a   :  { %3499 = vmatmul.mubr.msk.f32.vlgmr.msra.gmra.mrb[18].mxu1 %vm707_vm4, %v1650_v32  ;;  %3554 = vmatmul.mubr.msk.f32.vlgmr.msra.gmra.mrb[20].mxu0 %vm707_vm4, %v2025_v33 }
0x134b   :  { %3758 = vmatpush3.bf16.msra.mxu1 %v4364_v47  ;;  %3788 = vmatpush3.bf16.msra.mxu0 %v4437_v28 }
0x134c   :  { %3759 = vmatprep.subr.bf16.mxu1 %v4046_v0  ;;  %3789 = vmatprep.subr.bf16.mxu0 %v4046_v0 }
0x134d   :  { %3520 = vmatprep.mubr.msk.f32.mxu1 %vm4047_vm0, %v4048_v1  ;;  %3575 = vmatprep.mubr.msk.f32.mxu0 %vm4047_vm0, %v4048_v1 }
0x134f   :  { %3761 = vmatpush3.bf16.msra.mxu1 %v4375_v51  ;;  %3791 = vmatpush3.bf16.msra.mxu0 %v4450_v12 }
0x1350   :  { %3768 = vmatprep.subr.bf16.mxu1 %v4046_v0  ;;  %3798 = vmatprep.subr.bf16.mxu0 %v4046_v0 }
0x1352   :  { %3521 = vmatmul.mubr.msk.f32.vlgmr.msra.gmra.mrb[20].mxu1 %vm707_vm4, %v1800_v34  ;;  %3576 = vmatmul.mubr.f32.vlgmr.msra.gmra.mrb[22].mxu0 %v4048_v1 }
0x1353   :  { %3770 = vmatpush3.bf16.msra.mxu1 %v4364_v47  ;;  %3542 = vmatprep.mubr.msk.f32.mxu1 %vm4047_vm0, %v4048_v1 }
0x1354   :  { %3771 = vmatprep.subr.bf16.mxu1 %v4046_v0  ;;  %3800 = vmatpush3.bf16.msra.mxu0 %v4437_v28 }
0x1355   :  { %3801 = vmatprep.subr.bf16.mxu0 %v4046_v0  ;;  %3597 = vmatprep.mubr.msk.f32.mxu0 %vm4047_vm0, %v4048_v1 }
0x1357   :  { %3773 = vmatpush3.bf16.msra.mxu1 %v4375_v51 }
0x1358   :  { %3780 = vmatprep.subr.bf16.mxu1 %v4046_v0  ;;  %3803 = vmatpush3.bf16.msra.mxu0 %v4450_v12 }
0x1359   :  { %3810 = vmatprep.subr.bf16.mxu0 %v4046_v0 }
0x135a   :  { %3543 = vmatmul.mubr.msk.f32.vlgmr.msra.gmra.mrb[22].mxu1 %vm707_vm4, %v1950_v35 }
0x135b   :  { %3782 = vmatpush3.bf16.msra.mxu1 %v4364_v47  ;;  %3564 = vmatprep.mubr.msk.f32.mxu1 %vm4047_vm0, %v4048_v1 }
0x135c   :  { %3783 = vmatprep.subr.bf16.mxu1 %v4046_v0 }
0x135f   :  { %3785 = vmatpush3.bf16.msra.mxu1 %v4375_v51 }
0x1360   :  { %3792 = vmatprep.subr.bf16.mxu1 %v4046_v0 }
0x1415   :  { %v1527_v36 = vpop.f32.mrb[16].mxu1 }
0x1416   :  { %v1538_v37 = vadd.f32 %v1527_v36, %v4241_v29  ;;  %v3478_v15 = vpop.f32.mrb[17].mxu1  ;;  %v1531_v54 = vadd.f32 %v1527_v36, %v1458_v53 }
0x1418   :  { %1540 = vrot.lane.b32.xlu0 %v1538_v37, %s4049_s18  ;;  %v3158_v55 = vmul.f32 -1.442695, %v1531_v54 }
0x141a   :  { %3893 = vpow2.f32 %v3158_v55  ;;  %v2396_v55 = vld [vmem:[#allocation3 + $0x4] sm:$0x3] }
0x141d   :  { %v1720_v38 = vpop.f32.mrb[18].mxu1  ;;  %v2095_v39 = vpop.f32.mrb[20].mxu0 }
0x141e   :  { %v1721_v40 = vadd.f32 %v4405_v58, %v1720_v38  ;;  %v3500_v41 = vpop.f32.mrb[19].mxu1  ;;  %v2096_v42 = vadd.f32 %v4405_v58, %v2095_v39  ;;  %v3555_v43 = vpop.f32.mrb[21].mxu0 }
0x1420   :  { %1724 = vst.msk [vmem:[#allocation3 + $0x2] sm:$0x3] %vm160_vm2, %v1721_v40  ;;  %2099 = vst.msk [vmem:[#allocation3 + $0xc] sm:$0x3] %vm160_vm2, %v2096_v42 }
0x1424   :  { %v3894_v59 = vpop.eup %3893 }
0x1425   :  { %v1870_v45 = vpop.f32.mrb[20].mxu1  ;;  %v2247_v46 = vpop.f32.mrb[22].mxu0  ;;  %v1535_v61 = vadd.f32 1.0, %v3894_v59 }
0x1426   :  { %v1871_v29 = vadd.f32 %v4405_v58, %v1870_v45  ;;  %v2266_v47 = vadd.f32 %v4489_v44, %v2247_v46  ;;  %v3522_v48 = vpop.f32.mrb[21].mxu1  ;;  %v3577_v49 = vpop.f32.mrb[23].mxu0  ;;  %v2251_v57 = vadd.f32 %v2247_v46, %v2180_v56 }
0x1427   :  { %v2291_v37 = vld [vmem:[#allocation3 + $0x2] sm:$0x3] }
0x1428   :  { %1874 = vst.msk [vmem:[#allocation3 + $0x6] sm:$0x3] %vm160_vm2, %v1871_v29  ;;  %2268 = vrot.lane.b32.xlu1 %v2266_v47, %s4049_s18  ;;  %v3168_v60 = vmul.f32 -1.442695, %v2251_v57 }
0x142a   :  { %3895 = vpow2.f32 %v3168_v60 }
0x142b   :  { %3897 = vrcp.f32 %v1535_v61 }
0x142d   :  { %v2020_v50 = vpop.f32.mrb[22].mxu1 }
0x142e   :  { %v2021_v51 = vadd.f32 %v4405_v58, %v2020_v50  ;;  %v3544_v52 = vpop.f32.mrb[23].mxu1 }
0x1430   :  { %2024 = vst.msk [vmem:[#allocation3 + $0xa] sm:$0x3] %vm160_vm2, %v2021_v51 }
0x1434   :  { %v3896_v62 = vpop.eup %3895 }
0x1435   :  { %v3898_v63 = vpop.eup %3897  ;;  %v2255_v4 = vadd.f32 1.0, %v3896_v62 }
0x1436   :  { %v1550_v16 = vsub.f32 1.0, %v3898_v63  ;;  %v1556_v18 = vmul.f32 %v3898_v63, %v4416_v23 }
0x1437   :  { %3899 = vrcp.f32 %v2255_v4 }
0x1441   :  { %v3900_v5 = vpop.eup %3899 }
0x1442   :  { %v2278_v21 = vsub.f32 1.0, %v3900_v5  ;;  %v2284_v24 = vmul.f32 0.0, %v3900_v5 }
0x148a   :  { %v1541_v2 = vpop.permute.xlu0 %1540 }
0x148b   :  { %v1543_v3 = vmul.f32 %v3898_v63, %v1541_v2 }
0x148d   :  { %1545 = vrot.lane.b32.xlu0 %v1543_v3, %s4049_s18 }
0x149a   :  { %v2269_v6 = vpop.permute.xlu1 %2268 }
0x149b   :  { %v2271_v7 = vmul.f32 %v3900_v5, %v2269_v6 }
0x149d   :  { %2273 = vrot.lane.b32.xlu1 %v2271_v7, %s4049_s18 }
0x14ff   :  { %v1546_v8 = vpop.permute.xlu0 %1545 }
0x1500   :  { %v1548_v9 = vadd.f32 %v1546_v8, %v1458_v53 }
0x1502   :  { %3901 = vtanh.f32 %v1548_v9 }
0x150c   :  { %v3902_v10 = vpop.eup %3901 }
0x150d   :  { %1552 = vrot.lane.b32.xlu0 %v3902_v10, %s4050_s19 }
0x150f   :  { %v2274_v11 = vpop.permute.xlu1 %2273 }
0x1510   :  { %v2276_v13 = vadd.f32 %v2274_v11, %v2180_v56 }
0x1512   :  { %3903 = vtanh.f32 %v2276_v13 }
0x151c   :  { %v3904_v14 = vpop.eup %3903 }
0x151d   :  { %2280 = vrot.lane.b32.xlu1 %v3904_v14, %s4050_s19 }
0x157f   :  { %v1553_v17 = vpop.permute.xlu0 %1552 }
0x1580   :  { %v1555_v19 = vmul.f32 %v1553_v17, %v1550_v16  ;;  %v2501_v16 = vld [vmem:[#allocation3 + $0x6] sm:$0x3] }
0x1582   :  { %v1557_v20 = vadd.f32 %v1556_v18, %v1555_v19 }
0x1584   :  { %1559 = vrot.lane.b32.xlu0 %v1557_v20, %s4050_s19 }
0x158f   :  { %v2281_v22 = vpop.permute.xlu1 %2280 }
0x1590   :  { %v2283_v25 = vmul.f32 %v2281_v22, %v2278_v21 }
0x1592   :  { %v2285_v26 = vadd.f32 %v2284_v24, %v2283_v25 }
0x1594   :  { %2287 = vrot.lane.b32.xlu1 %v2285_v26, %s4050_s19 }
0x15f6   :  { %v1560_v27 = vpop.permute.xlu0 %1559 }
0x15f7   :  { %1563 = vst.msk [vmem:[#allocation2 + $0xe] sm:$0x3] %vm820_vm3, %v1560_v27 }
0x15fe   :  { %v2100_v30 = vld [vmem:[#allocation2 + $0xe] sm:$0x3] }
0x15ff   :  { %3565 = vmatmul.mubr.msk.f32.vlgmr.msra.gmra.mrb[24].mxu1 %vm707_vm4, %v2100_v30 }
0x1600   :  { %3794 = vmatpush3.bf16.msra.mxu1 %v4437_v28  ;;  %3586 = vmatprep.mubr.msk.f32.mxu1 %vm4047_vm0, %v4048_v1 }
0x1601   :  { %3795 = vmatprep.subr.bf16.mxu1 %v4046_v0 }
0x1604   :  { %3797 = vmatpush3.bf16.msra.mxu1 %v4450_v12 }
0x1605   :  { %3804 = vmatprep.subr.bf16.mxu1 %v4046_v0 }
0x1606   :  { %v2288_v23 = vpop.permute.xlu1 %2287 }
0x1607   :  { %2290 = vst.msk [vmem:[#allocation2] sm:$0x3] %vm820_vm3, %v2288_v23  ;;  %3587 = vmatmul.mubr.msk.f32.vlgmr.msra.gmra.mrb[26].mxu1 %vm707_vm4, %v2288_v23 }
0x1608   :  { %3806 = vmatpush3.bf16.msra.mxu1 %v4437_v28  ;;  %3608 = vmatprep.mubr.msk.f32.mxu1 %vm4047_vm0, %v4048_v1 }
0x1609   :  { %3807 = vmatprep.subr.bf16.mxu1 %v4046_v0 }
0x160c   :  { %3809 = vmatpush3.bf16.msra.mxu1 %v4450_v12 }
0x160d   :  { %3816 = vmatprep.subr.bf16.mxu1 %v4046_v0 }
0x16d2   :  { %v2170_v31 = vpop.f32.mrb[24].mxu1 }
0x16d3   :  { %v2171_v32 = vadd.f32 %v4405_v58, %v2170_v31  ;;  %v3566_v33 = vpop.f32.mrb[25].mxu1 }
0x16d5   :  { %2174 = vst.msk [vmem:[#allocation3 + $0xe] sm:$0x3] %vm160_vm2, %v2171_v32 }
0x16da   :  { %v2360_v34 = vpop.f32.mrb[26].mxu1 }
0x16db   :  { %v2371_v35 = vadd.f32 %v2360_v34, %v4489_v44  ;;  %v3588_v36 = vpop.f32.mrb[27].mxu1  ;;  %v2364_v15 = vadd.f32 %v2360_v34, %v2291_v37 }
0x16dd   :  { %2373 = vrot.lane.b32.xlu0 %v2371_v35, %s4049_s18  ;;  %v3171_v38 = vmul.f32 -1.442695, %v2364_v15  ;;  %v2606_v15 = vld [vmem:[#allocation3 + $0x8] sm:$0x3] }
0x16df   :  { %3905 = vpow2.f32 %v3171_v38 }
0x16e9   :  { %v3906_v39 = vpop.eup %3905 }
0x16ea   :  { %v2368_v40 = vadd.f32 1.0, %v3906_v39 }
0x16ec   :  { %3907 = vrcp.f32 %v2368_v40 }
0x16f6   :  { %v3908_v41 = vpop.eup %3907 }
0x16f7   :  { %v2383_v29 = vsub.f32 1.0, %v3908_v41  ;;  %v2389_v48 = vmul.f32 %v3908_v41, %v2285_v26 }
0x174f   :  { %v2374_v42 = vpop.permute.xlu0 %2373 }
0x1750   :  { %v2376_v43 = vmul.f32 %v3908_v41, %v2374_v42 }
0x1752   :  { %2378 = vrot.lane.b32.xlu1 %v2376_v43, %s4049_s18 }
0x17c4   :  { %v2379_v58 = vpop.permute.xlu1 %2378 }
0x17c5   :  { %v2381_v45 = vadd.f32 %v2379_v58, %v2291_v37 }
0x17c7   :  { %3909 = vtanh.f32 %v2381_v45 }
0x17d1   :  { %v3910_v46 = vpop.eup %3909 }
0x17d2   :  { %2385 = vrot.lane.b32.xlu0 %v3910_v46, %s4050_s19 }
0x1844   :  { %v2386_v47 = vpop.permute.xlu0 %2385 }
0x1845   :  { %v2388_v49 = vmul.f32 %v2386_v47, %v2383_v29 }
0x1847   :  { %v2390_v50 = vadd.f32 %v2389_v48, %v2388_v49 }
0x1849   :  { %2392 = vrot.lane.b32.xlu1 %v2390_v50, %s4050_s19 }
0x18bb   :  { %v2393_v51 = vpop.permute.xlu1 %2392 }
0x18bc   :  { %2395 = vst.msk [vmem:[#allocation2 + $0x2] sm:$0x3] %vm820_vm3, %v2393_v51  ;;  %3598 = vmatmul.mubr.msk.f32.vlgmr.msra.gmra.mrb[24].mxu0 %vm707_vm4, %v2393_v51 }
0x18bd   :  { %3812 = vmatpush3.bf16.msra.mxu0 %v4437_v28  ;;  %3619 = vmatprep.mubr.msk.f32.mxu0 %vm4047_vm0, %v4048_v1 }
0x18be   :  { %3813 = vmatprep.subr.bf16.mxu0 %v4046_v0 }
0x18c1   :  { %3815 = vmatpush3.bf16.msra.mxu0 %v4450_v12 }
0x18c2   :  { %3822 = vmatprep.subr.bf16.mxu0 %v4046_v0 }
0x198f   :  { %v2465_v52 = vpop.f32.mrb[24].mxu0 }
0x1990   :  { %v2476_v53 = vadd.f32 %v2465_v52, %v4489_v44  ;;  %v3599_v54 = vpop.f32.mrb[25].mxu0  ;;  %v2469_v56 = vadd.f32 %v2465_v52, %v2396_v55 }
0x1992   :  { %2478 = vrot.lane.b32.xlu0 %v2476_v53, %s4049_s18  ;;  %v3173_v57 = vmul.f32 -1.442695, %v2469_v56  ;;  %v2711_v56 = vld [vmem:[#allocation3 + $0xa] sm:$0x3] }
0x1994   :  { %3911 = vpow2.f32 %v3173_v57 }
0x199e   :  { %v3912_v59 = vpop.eup %3911 }
0x199f   :  { %v2473_v60 = vadd.f32 1.0, %v3912_v59 }
0x19a1   :  { %3913 = vrcp.f32 %v2473_v60 }
0x19ab   :  { %v3914_v61 = vpop.eup %3913 }
0x19ac   :  { %v2488_v5 = vsub.f32 1.0, %v3914_v61  ;;  %v2494_v7 = vmul.f32 %v3914_v61, %v2390_v50 }
0x1a04   :  { %v2479_v62 = vpop.permute.xlu0 %2478 }
0x1a05   :  { %v2481_v63 = vmul.f32 %v3914_v61, %v2479_v62 }
0x1a07   :  { %2483 = vrot.lane.b32.xlu1 %v2481_v63, %s4049_s18 }
0x1a79   :  { %v2484_v2 = vpop.permute.xlu1 %2483 }
0x1a7a   :  { %v2486_v3 = vadd.f32 %v2484_v2, %v2396_v55 }
0x1a7c   :  { %3915 = vtanh.f32 %v2486_v3 }
0x1a86   :  { %v3916_v4 = vpop.eup %3915 }
0x1a87   :  { %2490 = vrot.lane.b32.xlu0 %v3916_v4, %s4050_s19 }
0x1af9   :  { %v2491_v6 = vpop.permute.xlu0 %2490 }
0x1afa   :  { %v2493_v8 = vmul.f32 %v2491_v6, %v2488_v5 }
0x1afc   :  { %v2495_v9 = vadd.f32 %v2494_v7, %v2493_v8 }
0x1afe   :  { %2497 = vrot.lane.b32.xlu1 %v2495_v9, %s4050_s19 }
0x1b70   :  { %v2498_v10 = vpop.permute.xlu1 %2497 }
0x1b71   :  { %2500 = vst.msk [vmem:[#allocation2 + $0x4] sm:$0x3] %vm820_vm3, %v2498_v10  ;;  %3609 = vmatmul.mubr.msk.f32.vlgmr.msra.gmra.mrb[28].mxu1 %vm707_vm4, %v2498_v10 }
0x1b72   :  { %3818 = vmatpush3.bf16.msra.mxu1 %v4437_v28  ;;  %3630 = vmatprep.mubr.msk.f32.mxu1 %vm4047_vm0, %v4048_v1 }
0x1b73   :  { %3819 = vmatprep.subr.bf16.mxu1 %v4046_v0 }
0x1b76   :  { %3821 = vmatpush3.bf16.msra.mxu1 %v4450_v12 }
0x1b77   :  { %3828 = vmatprep.subr.bf16.mxu1 %v4046_v0 }
0x1c44   :  { %v2570_v11 = vpop.f32.mrb[28].mxu1 }
0x1c45   :  { %v2581_v13 = vadd.f32 %v2570_v11, %v4489_v44  ;;  %v3610_v14 = vpop.f32.mrb[29].mxu1  ;;  %v2574_v17 = vadd.f32 %v2570_v11, %v2501_v16 }
0x1c46   :  { %v2816_v14 = vld [vmem:[#allocation3 + $0xc] sm:$0x3] }
0x1c47   :  { %2583 = vrot.lane.b32.xlu0 %v2581_v13, %s4049_s18  ;;  %v3175_v18 = vmul.f32 -1.442695, %v2574_v17 }
0x1c49   :  { %3917 = vpow2.f32 %v3175_v18 }
0x1c53   :  { %v3918_v19 = vpop.eup %3917 }
0x1c54   :  { %v2578_v20 = vadd.f32 1.0, %v3918_v19 }
0x1c56   :  { %3919 = vrcp.f32 %v2578_v20 }
0x1c60   :  { %v3920_v21 = vpop.eup %3919 }
0x1c61   :  { %v2593_v30 = vsub.f32 1.0, %v3920_v21  ;;  %v2599_v31 = vmul.f32 %v3920_v21, %v2495_v9 }
0x1cb9   :  { %v2584_v22 = vpop.permute.xlu0 %2583 }
0x1cba   :  { %v2586_v24 = vmul.f32 %v3920_v21, %v2584_v22 }
0x1cbc   :  { %2588 = vrot.lane.b32.xlu1 %v2586_v24, %s4049_s18 }
0x1d2e   :  { %v2589_v25 = vpop.permute.xlu1 %2588 }
0x1d2f   :  { %v2591_v26 = vadd.f32 %v2589_v25, %v2501_v16 }
0x1d31   :  { %3921 = vtanh.f32 %v2591_v26 }
0x1d3b   :  { %v3922_v27 = vpop.eup %3921 }
0x1d3c   :  { %2595 = vrot.lane.b32.xlu0 %v3922_v27, %s4050_s19 }
0x1dae   :  { %v2596_v23 = vpop.permute.xlu0 %2595 }
0x1daf   :  { %v2598_v32 = vmul.f32 %v2596_v23, %v2593_v30 }
0x1db1   :  { %v2600_v33 = vadd.f32 %v2599_v31, %v2598_v32 }
0x1db3   :  { %2602 = vrot.lane.b32.xlu1 %v2600_v33, %s4050_s19 }
0x1e25   :  { %v2603_v34 = vpop.permute.xlu1 %2602 }
0x1e26   :  { %2605 = vst.msk [vmem:[#allocation2 + $0x6] sm:$0x3] %vm820_vm3, %v2603_v34  ;;  %3620 = vmatmul.mubr.msk.f32.vlgmr.msra.gmra.mrb[26].mxu0 %vm707_vm4, %v2603_v34 }
0x1e27   :  { %3824 = vmatpush3.bf16.msra.mxu0 %v4437_v28  ;;  %3641 = vmatprep.mubr.msk.f32.mxu0 %vm4047_vm0, %v4048_v1 }
0x1e28   :  { %3825 = vmatprep.subr.bf16.mxu0 %v4046_v0 }
0x1e2b   :  { %3827 = vmatpush3.bf16.msra.mxu0 %v4450_v12 }
0x1e2c   :  { %3834 = vmatprep.subr.bf16.mxu0 %v4046_v0 }
0x1ef9   :  { %v2675_v35 = vpop.f32.mrb[26].mxu0 }
0x1efa   :  { %v2686_v36 = vadd.f32 %v2675_v35, %v4489_v44  ;;  %v3621_v37 = vpop.f32.mrb[27].mxu0  ;;  %v2679_v38 = vadd.f32 %v2675_v35, %v2606_v15 }
0x1efc   :  { %2688 = vrot.lane.b32.xlu0 %v2686_v36, %s4049_s18  ;;  %v3177_v39 = vmul.f32 -1.442695, %v2679_v38  ;;  %v2921_v36 = vld [vmem:[#allocation3 + $0xe] sm:$0x3] }
0x1efe   :  { %3923 = vpow2.f32 %v3177_v39 }
0x1f08   :  { %v3924_v40 = vpop.eup %3923 }
0x1f09   :  { %v2683_v41 = vadd.f32 1.0, %v3924_v40 }
0x1f0b   :  { %3925 = vrcp.f32 %v2683_v41 }
0x1f15   :  { %v3926_v42 = vpop.eup %3925 }
0x1f16   :  { %v2698_v47 = vsub.f32 1.0, %v3926_v42  ;;  %v2704_v49 = vmul.f32 %v3926_v42, %v2600_v33 }
0x1f6e   :  { %v2689_v43 = vpop.permute.xlu0 %2688 }
0x1f6f   :  { %v2691_v58 = vmul.f32 %v3926_v42, %v2689_v43 }
0x1f71   :  { %2693 = vrot.lane.b32.xlu1 %v2691_v58, %s4049_s18 }
0x1fe3   :  { %v2694_v45 = vpop.permute.xlu1 %2693 }
0x1fe4   :  { %v2696_v46 = vadd.f32 %v2694_v45, %v2606_v15  ;;  %v3027_v45 = vld [vmem:[%s4630_s9 + $0x8] sm:$0xff] }
0x1fe6   :  { %3927 = vtanh.f32 %v2696_v46  ;;  %v3028_v46 = vld [vmem:[%s4630_s9 + $0x10] sm:$0xff] }
0x1ff0   :  { %v3928_v29 = vpop.eup %3927 }
0x1ff1   :  { %2700 = vrot.lane.b32.xlu0 %v3928_v29, %s4050_s19 }
0x2063   :  { %v2701_v48 = vpop.permute.xlu0 %2700 }
0x2064   :  { %v2703_v50 = vmul.f32 %v2701_v48, %v2698_v47  ;;  %v3029_v47 = vld [vmem:[%s4630_s9 + $0x18] sm:$0xff] }
0x2065   :  { %v3838_v48 = vpack.c.bf16 %v3029_v47, %v3028_v46 }
0x2066   :  { %v2705_v51 = vadd.f32 %v2704_v49, %v2703_v50 }
0x2068   :  { %2707 = vrot.lane.b32.xlu1 %v2705_v51, %s4050_s19 }
0x20da   :  { %v2708_v52 = vpop.permute.xlu1 %2707 }
0x20db   :  { %2710 = vst.msk [vmem:[#allocation2 + $0x8] sm:$0x3] %vm820_vm3, %v2708_v52  ;;  %3631 = vmatmul.mubr.msk.f32.vlgmr.msra.gmra.mrb[30].mxu1 %vm707_vm4, %v2708_v52 }
0x20dc   :  { %3830 = vmatpush3.bf16.msra.mxu1 %v4437_v28  ;;  %3652 = vmatprep.mubr.msk.f32.mxu1 %vm4047_vm0, %v4048_v1 }
0x20dd   :  { %3831 = vmatprep.subr.bf16.mxu1 %v4046_v0 }
0x20e0   :  { %3833 = vmatpush3.bf16.msra.mxu1 %v4450_v12 }
0x21ae   :  { %v2780_v53 = vpop.f32.mrb[30].mxu1 }
0x21af   :  { %v2791_v54 = vadd.f32 %v2780_v53, %v4489_v44  ;;  %v3632_v55 = vpop.f32.mrb[31].mxu1  ;;  %v2784_v57 = vadd.f32 %v2780_v53, %v2711_v56 }
0x21b1   :  { %2793 = vrot.lane.b32.xlu0 %v2791_v54, %s4049_s18  ;;  %v3179_v59 = vmul.f32 -1.442695, %v2784_v57 }
0x21b3   :  { %3929 = vpow2.f32 %v3179_v59 }
0x21bd   :  { %v3930_v60 = vpop.eup %3929 }
0x21be   :  { %v2788_v61 = vadd.f32 1.0, %v3930_v60 }
0x21c0   :  { %3931 = vrcp.f32 %v2788_v61 }
0x21ca   :  { %v3932_v28 = vpop.eup %3931 }
0x21cb   :  { %v2803_v4 = vsub.f32 1.0, %v3932_v28  ;;  %v2809_v6 = vmul.f32 %v3932_v28, %v2705_v51 }
0x2223   :  { %v2794_v62 = vpop.permute.xlu0 %2793 }
0x2224   :  { %v2796_v63 = vmul.f32 %v3932_v28, %v2794_v62 }
0x2226   :  { %2798 = vrot.lane.b32.xlu1 %v2796_v63, %s4049_s18 }
0x2298   :  { %v2799_v2 = vpop.permute.xlu1 %2798 }
0x2299   :  { %v2801_v12 = vadd.f32 %v2799_v2, %v2711_v56  ;;  %v3184_v56 = vld [vmem:[#allocation9] ss:$0 sm:$0xff] }
0x229b   :  { %3933 = vtanh.f32 %v2801_v12 }
0x22a5   :  { %v3934_v3 = vpop.eup %3933 }
0x22a6   :  { %2805 = vrot.lane.b32.xlu0 %v3934_v3, %s4050_s19 }
0x2318   :  { %v2806_v5 = vpop.permute.xlu0 %2805 }
0x2319   :  { %v2808_v7 = vmul.f32 %v2806_v5, %v2803_v4 }
0x231b   :  { %v2810_v8 = vadd.f32 %v2809_v6, %v2808_v7 }
0x231d   :  { %2812 = vrot.lane.b32.xlu1 %v2810_v8, %s4050_s19 }
0x238f   :  { %v2813_v9 = vpop.permute.xlu1 %2812 }
0x2390   :  { %2815 = vst.msk [vmem:[#allocation2 + $0xa] sm:$0x3] %vm820_vm3, %v2813_v9  ;;  %3642 = vmatmul.mubr.msk.f32.vlgmr.msra.gmra.mrb[28].mxu0 %vm707_vm4, %v2813_v9 }
0x2391   :  { %3663 = vmatprep.mubr.msk.f32.mxu0 %vm4047_vm0, %v4048_v1 }
0x2463   :  { %v2885_v10 = vpop.f32.mrb[28].mxu0 }
0x2464   :  { %v2896_v11 = vadd.f32 %v2885_v10, %v4489_v44  ;;  %v3643_v13 = vpop.f32.mrb[29].mxu0  ;;  %v2889_v16 = vadd.f32 %v2885_v10, %v2816_v14 }
0x2466   :  { %2898 = vrot.lane.b32.xlu0 %v2896_v11, %s4049_s18  ;;  %v3181_v17 = vmul.f32 -1.442695, %v2889_v16 }
0x2468   :  { %3935 = vpow2.f32 %v3181_v17 }
0x2472   :  { %v3936_v18 = vpop.eup %3935 }
0x2473   :  { %v2893_v19 = vadd.f32 1.0, %v3936_v18 }
0x2475   :  { %3937 = vrcp.f32 %v2893_v19 }
0x247f   :  { %v3938_v20 = vpop.eup %3937 }
0x2480   :  { %v2908_v26 = vsub.f32 1.0, %v3938_v20  ;;  %v2914_v30 = vmul.f32 %v3938_v20, %v2810_v8 }
0x24d8   :  { %v2899_v21 = vpop.permute.xlu0 %2898 }
0x24d9   :  { %v2901_v22 = vmul.f32 %v3938_v20, %v2899_v21 }
0x24db   :  { %2903 = vrot.lane.b32.xlu1 %v2901_v22, %s4049_s18 }
0x254d   :  { %v2904_v24 = vpop.permute.xlu1 %2903 }
0x254e   :  { %v2906_v1 = vadd.f32 %v2904_v24, %v2816_v14 }
0x2550   :  { %3939 = vtanh.f32 %v2906_v1 }
0x255a   :  { %v3940_v25 = vpop.eup %3939 }
0x255b   :  { %2910 = vrot.lane.b32.xlu0 %v3940_v25, %s4050_s19 }
0x25cd   :  { %v2911_v27 = vpop.permute.xlu0 %2910 }
0x25ce   :  { %v2913_v23 = vmul.f32 %v2911_v27, %v2908_v26 }
0x25d0   :  { %v2915_v31 = vadd.f32 %v2914_v30, %v2913_v23 }
0x25d2   :  { %2917 = vrot.lane.b32.xlu1 %v2915_v31, %s4050_s19 }
0x2644   :  { %v2918_v32 = vpop.permute.xlu1 %2917 }
0x2645   :  { %2920 = vst.msk [vmem:[#allocation2 + $0xc] sm:$0x3] %vm820_vm3, %v2918_v32  ;;  %3653 = vmatmul.mubr.msk.f32.vlgmr.msra.gmra.mrb[32].mxu1 %vm707_vm4, %v2918_v32 }
0x2718   :  { %v2990_v33 = vpop.f32.mrb[32].mxu1 }
0x2719   :  { %v3001_v34 = vadd.f32 %v2990_v33, %v4489_v44  ;;  %v3654_v35 = vpop.f32.mrb[33].mxu1  ;;  %v2994_v37 = vadd.f32 %v2990_v33, %v2921_v36  ;;  %v3026_v44 = vld [vmem:[%s4630_s9] sm:$0xff]  ;;  %s4051_s9 = smov [#allocation10]  }
0x271a   :  { %v3835_v29 = vpack.c.bf16 %v3027_v45, %v3026_v44 }
0x271b   :  { %3003 = vrot.lane.b32.xlu0 %v3001_v34, %s4049_s18  ;;  %v3183_v15 = vmul.f32 -1.442695, %v2994_v37 }
0x271c   :  { %3836 = vmatpush3.bf16.msra.mxu0 %v3835_v29 }
0x271d   :  { %3941 = vpow2.f32 %v3183_v15  ;;  %3837 = vmatprep.subr.bf16.mxu0 %v4046_v0 }
0x2720   :  { %3839 = vmatpush3.bf16.msra.mxu0 %v3838_v48 }
0x2727   :  { %v3942_v38 = vpop.eup %3941 }
0x2728   :  { %v2998_v39 = vadd.f32 1.0, %v3942_v38 }
0x272a   :  { %3943 = vrcp.f32 %v2998_v39 }
0x2734   :  { %v3944_v40 = vpop.eup %3943 }
0x2735   :  { %v3013_v50 = vsub.f32 1.0, %v3944_v40  ;;  %v3019_v52 = vmul.f32 %v3944_v40, %v2915_v31 }
0x278d   :  { %v3004_v41 = vpop.permute.xlu0 %3003 }
0x278e   :  { %v3006_v42 = vmul.f32 %v3944_v40, %v3004_v41 }
0x2790   :  { %3008 = vrot.lane.b32.xlu1 %v3006_v42, %s4049_s18  ;;  %s3117_s18 = sshll.u32 %s4051_s9, 4  ;;  %s3118_s18 = int_to_ptr.vmem [resolvable:$true] %s3117_s18 }
0x2791   :  { %s4013_s22 = scalar_lea.vmem %s3118_s18, 32  ;;  %p4018_p11 = scmp.lt.s32.totalorder %s3118_s18, %s3118_s18 }
0x2792   :  { %p4014_p10 = scmp.ne.s32.totalorder %s3118_s18, %s4013_s22  ;;  %p4019_p12 = scmp.lt.s32.totalorder %s4013_s22, %s4013_s22 }
0x2794   :  { %p4020_p13 = por %p4019_p12, %p4018_p11 }
0x2796   :  { %p4021_p0 = pnand %p4020_p13, %p4014_p10 }
0x2802   :  { %v3009_v43 = vpop.permute.xlu1 %3008 }
0x2803   :  { %v3011_v58 = vadd.f32 %v3009_v43, %v2921_v36 }
0x2805   :  { %3945 = vtanh.f32 %v3011_v58 }
0x280f   :  { %v3946_v49 = vpop.eup %3945 }
0x2810   :  { %3015 = vrot.lane.b32.xlu0 %v3946_v49, %s4050_s19 }
0x2882   :  { %v3016_v51 = vpop.permute.xlu0 %3015 }
0x2883   :  { %v3018_v53 = vmul.f32 %v3016_v51, %v3013_v50 }
0x2885   :  { %v3020_v54 = vadd.f32 %v3019_v52, %v3018_v53 }
0x2887   :  { %3022 = vrot.lane.b32.xlu1 %v3020_v54, %s4050_s19 }
0x28f9   :  { %v3023_v55 = vpop.permute.xlu1 %3022 }
0x28fa   :  { %3025 = vst.msk [vmem:[#allocation2 + $0xe] sm:$0x3] %vm820_vm3, %v3023_v55  ;;  %3664 = vmatmul.mubr.msk.f32.vlgmr.msra.gmra.mrb[30].mxu0 %vm707_vm4, %v3023_v55 }
0x29cd   :  { %v3105_v0 = vpop.f32.mrb[30].mxu0 }
0x29ce   :  { %v3106_v57 = vadd.f32 %v3184_v56, %v3105_v0  ;;  %v3665_v59 = vpop.f32.mrb[31].mxu0 }
0x29d0   :  { %3110 = vst.msk [vmem:[#allocation10] sm:$0x3] %vm3109_vm5, %v3106_v57 }
0x29d1   :  { %4024 = shalt.err (!%p4021_p0)
}
0x29d2   :  { %s4025_s7 = scalar_lea.hbm %s4632_s11, 32 }
0x29d3   :  { %p4026_p1 = scmp.ne.s32.totalorder %s4632_s11, %s4025_s7  ;;  %p4029_p2 = scmp.lt.u32.totalorder %s4025_s7, %s4632_s11 }
0x29d5   :  { %p4031_p3 = pnand %p4029_p2, %p4026_p1 }
0x29d7   :  { %4034 = shalt.err (!%p4031_p3)
}
0x29d8   :  { %3120 = dma.vmem_to_hbm [thread:$0]  %s3118_s18, 32, %s4632_s11, [#allocation6]  }
0x29d9   :  { %4039 = dma.done.wait [#allocation6], 32  }
0x29da   :  { %4040 = vsyncadd [#allocation6], 4294967264 }
0x29db   :  { %3124 = vsyncpa [#allocation5], 1 }
0x29dc   :  { %3125 = vsyncpa [#allocation8], 1 }
0x29dd   :  { %3126 = vsyncpa [#allocation6], 1 }

</bundles_post_ra>
